<compile_context>
chip_gen: v5e
topology: v5e:2x2
jax: 0.10.0
libtpu: 0.0.40
codegen_flags: <defaults>
</compile_context>

<pallas_src>
import functools

import jax
import jax.numpy as jnp
from jax.experimental import pallas as pl
from jax.experimental.pallas import tpu as pltpu

HP = 128   # per-gate lane padding (one vreg lane width)
VP = 256   # padded vocab size (contraction dim of the fused gather table)


def encoder_lstm_kernel(ids_ref, gtbl_ref, whh_ref, hc_ref, *, seq, batch):
    SB = ids_ref.shape[0]          # seq * batch
    vp = gtbl_ref.shape[0]         # padded vocab
    hp = whh_ref.shape[0]          # padded hidden (128)
    h3 = 3 * hp

    # ---- exact embedding gather fused with the input projection:
    #      one-hot(ids) @ (emb @ W_ih^T + bias), gate-permuted & lane-padded ----
    iota = jax.lax.broadcasted_iota(jnp.int32, (SB, vp), 1)
    onehot = (iota == ids_ref[...]).astype(jnp.float32)               # (SB, vp)
    gates_x = jnp.dot(onehot, gtbl_ref[...],
                      preferred_element_type=jnp.float32)             # (SB, 4*hp)

    whh_t = whh_ref[...]           # (hp, 4*hp), gate order [i, f, o, g]

    h = jnp.zeros((batch, hp), jnp.float32)
    c = jnp.zeros((batch, hp), jnp.float32)

    # seq is static and small -> fully unroll; the whole recurrence stays in
    # registers (no VMEM round-trip, no 3-D scratch relayout).
    for t in range(seq):
        g = gates_x[t * batch:(t + 1) * batch, :] + jnp.dot(
            h, whh_t, preferred_element_type=jnp.float32)             # (B, 4*hp)
        sig = jax.nn.sigmoid(g[:, :h3])        # i, f, o in a single wide EUP call
        g_g = jnp.tanh(g[:, h3:])              # candidate gate
        i_g = sig[:, :hp]
        f_g = sig[:, hp:2 * hp]
        o_g = sig[:, 2 * hp:h3]
        c = f_g * c + i_g * g_g
        h = o_g * jnp.tanh(c)

    # single lane-dense output: [0] = hidden, [1] = cell (padded lanes are 0)
    hc_ref[0, :, :] = h
    hc_ref[1, :, :] = c


def _prep_weights(emb, wih, whh, bih, bhh):
    """Build the fused gather table and the padded recurrent weights."""
    V, _ = emb.shape
    H = whh.shape[1]

    # fused input table: row v = emb[v] @ W_ih^T + (b_ih + b_hh); cols [i,f,g,o]
    g_raw = emb @ wih.T + (bih + bhh)[None, :]                 # (V, 4H)

    def permute_pad_cols(m):
        # PyTorch gate order i,f,g,o  ->  [i | f | o | g], each padded to HP lanes
        blocks = [m[:, 0:H], m[:, H:2 * H], m[:, 3 * H:4 * H], m[:, 2 * H:3 * H]]
        return jnp.concatenate(
            [jnp.pad(b, ((0, 0), (0, HP - H))) for b in blocks], axis=1)

    g_tbl = permute_pad_cols(g_raw)                            # (V, 4*HP)
    g_tbl = jnp.pad(g_tbl, ((0, VP - V), (0, 0)))              # (VP, 4*HP)

    whh_t = permute_pad_cols(whh.T)                            # (H, 4*HP)
    whh_t = jnp.pad(whh_t, ((0, HP - H), (0, 0)))              # (HP, 4*HP)

    return g_tbl.astype(jnp.float32), whh_t.astype(jnp.float32)


def encoder_forward(x, params):
    """x: (seq_len, batch) int32 ids. Returns (hidden, cell), each (1, batch, H)."""
    emb, wih, whh, bih, bhh = params
    seq, B = x.shape
    H = whh.shape[1]

    g_tbl, whh_t = _prep_weights(emb, wih, whh, bih, bhh)
    ids = x.reshape(seq * B, 1).astype(jnp.int32)              # time-major flatten

    hc = pl.pallas_call(
        functools.partial(encoder_lstm_kernel, seq=seq, batch=B),
        out_shape=jax.ShapeDtypeStruct((2, B, HP), jnp.float32),
        in_specs=[pl.BlockSpec(memory_space=pltpu.MemorySpace.VMEM)] * 3,
        out_specs=pl.BlockSpec(memory_space=pltpu.MemorySpace.VMEM),
    )(ids, g_tbl, whh_t)

    h = hc[0, :, :H]
    c = hc[1, :, :H]
    return h[None], c[None]    # (num_layers=1, batch, H), matching PyTorch


def encoder_ref(x, emb, wih, whh, bih, bhh):
    """Pure-JAX reference of the PyTorch forward pass (gate order i, f, g, o)."""
    embedded = emb[x]                                          # (seq, B, E)
    B = x.shape[1]
    H = whh.shape[1]

    def step(carry, x_t):
        h, c = carry
        g = x_t @ wih.T + bih + h @ whh.T + bhh
        i_g, f_g, g_g, o_g = jnp.split(g, 4, axis=-1)
        i_g = jax.nn.sigmoid(i_g)
        f_g = jax.nn.sigmoid(f_g)
        g_g = jnp.tanh(g_g)
        o_g = jax.nn.sigmoid(o_g)
        c = f_g * c + i_g * g_g
        h = o_g * jnp.tanh(c)
        return (h, c), None

    init = (jnp.zeros((B, H), jnp.float32), jnp.zeros((B, H), jnp.float32))
    (h, c), _ = jax.lax.scan(step, init, embedded)
    return h[None], c[None]


if __name__ == "__main__":
    V, E, H = 201, 64, 40          # vocab, embedding_dim, lstm hidden
    seq, B = 8, 2                  # small seq_len, batch

    key = jax.random.PRNGKey(0)
    k1, k2, k3, k4, k5, kx = jax.random.split(key, 6)
    scale = 1.0 / jnp.sqrt(jnp.float32(H))

    emb = jax.random.normal(k1, (V, E), jnp.float32)                       # nn.Embedding weight
    wih = jax.random.uniform(k2, (4 * H, E), jnp.float32, -scale, scale)   # weight_ih_l0
    whh = jax.random.uniform(k3, (4 * H, H), jnp.float32, -scale, scale)   # weight_hh_l0
    bih = jax.random.uniform(k4, (4 * H,), jnp.float32, -scale, scale)     # bias_ih_l0
    bhh = jax.random.uniform(k5, (4 * H,), jnp.float32, -scale, scale)     # bias_hh_l0
    params = (emb, wih, whh, bih, bhh)

    x = jax.random.randint(kx, (seq, B), 0, V, jnp.int32)   # token ids, time-major

    hidden, cell = jax.block_until_ready(encoder_forward(x, params))

    h_ref, c_ref = encoder_ref(x, *params)
    assert hidden.shape == (1, B, H) and cell.shape == (1, B, H)
    assert jnp.allclose(hidden, h_ref, atol=2e-3, rtol=2e-3)
    assert jnp.allclose(cell, c_ref, atol=2e-3, rtol=2e-3)

    print("KERNEL_OK")
</pallas_src>

<mosaic_0001>
module attributes {stable_mosaic.version = 11 : i64} {
  func.func @encoder_lstm_kernel(%arg0: memref<16x1xi32, #tpu.memory_space<vmem>>, %arg1: memref<256x512xf32, #tpu.memory_space<vmem>>, %arg2: memref<128x512xf32, #tpu.memory_space<vmem>>, %arg3: memref<2x2x128xf32, #tpu.memory_space<vmem>>) attributes {dimension_semantics = [], scalar_prefetch = 0 : i64, scratch_operands = 0 : i64, tpu.core_type = #tpu.core_type<tc>} {
    %0 = tpu.iota {dimensions = array<i32: 1>} : vector<16x256xi32>
    %c0 = arith.constant 0 : index
    %c0_0 = arith.constant 0 : index
    %1 = vector.load %arg0[%c0, %c0_0] : memref<16x1xi32, #tpu.memory_space<vmem>>, vector<16x1xi32>
    %2 = vector.broadcast %1 : vector<16x1xi32> to vector<16x256xi32>
    %3 = arith.cmpi eq, %0, %2 : vector<16x256xi32>
    %4 = arith.extui %3 : vector<16x256xi1> to vector<16x256xi32>
    %5 = arith.sitofp %4 : vector<16x256xi32> to vector<16x256xf32>
    %c0_1 = arith.constant 0 : index
    %c0_2 = arith.constant 0 : index
    %6 = vector.load %arg1[%c0_1, %c0_2] : memref<256x512xf32, #tpu.memory_space<vmem>>, vector<256x512xf32>
    %cst = arith.constant dense<0.000000e+00> : vector<16x512xf32>
    %7 = tpu.matmul %5, %6, %cst {dimension_numbers = #tpu.dot_dimension_numbers<[1], [0], [0], [1], [0, 0, 1, 1], [], []>} : vector<16x256xf32>, vector<256x512xf32>, vector<16x512xf32> -> vector<16x512xf32>
    %c0_3 = arith.constant 0 : index
    %c0_4 = arith.constant 0 : index
    %8 = vector.load %arg2[%c0_3, %c0_4] : memref<128x512xf32, #tpu.memory_space<vmem>>, vector<128x512xf32>
    %cst_5 = arith.constant 0.000000e+00 : f32
    %9 = vector.broadcast %cst_5 : f32 to vector<2x128xf32>
    %cst_6 = arith.constant 0.000000e+00 : f32
    %10 = vector.broadcast %cst_6 : f32 to vector<2x128xf32>
    %11 = vector.extract_strided_slice %7 {offsets = [0, 0], sizes = [2, 512], strides = [1, 1]} : vector<16x512xf32> to vector<2x512xf32>
    %cst_7 = arith.constant dense<0.000000e+00> : vector<2x512xf32>
    %12 = tpu.matmul %9, %8, %cst_7 {dimension_numbers = #tpu.dot_dimension_numbers<[1], [0], [0], [1], [0, 0, 1, 1], [], []>} : vector<2x128xf32>, vector<128x512xf32>, vector<2x512xf32> -> vector<2x512xf32>
    %13 = arith.addf %11, %12 : vector<2x512xf32>
    %14 = vector.extract_strided_slice %13 {offsets = [0, 0], sizes = [2, 384], strides = [1, 1]} : vector<2x512xf32> to vector<2x384xf32>
    %15 = arith.negf %14 : vector<2x384xf32>
    %16 = math.exp %15 : vector<2x384xf32>
    %cst_8 = arith.constant 1.000000e+00 : f32
    %17 = vector.broadcast %cst_8 : f32 to vector<2x384xf32>
    %18 = arith.addf %17, %16 : vector<2x384xf32>
    %19 = arith.divf %17, %18 : vector<2x384xf32>
    %20 = vector.extract_strided_slice %13 {offsets = [0, 384], sizes = [2, 128], strides = [1, 1]} : vector<2x512xf32> to vector<2x128xf32>
    %21 = math.tanh %20 : vector<2x128xf32>
    %22 = vector.extract_strided_slice %19 {offsets = [0, 0], sizes = [2, 128], strides = [1, 1]} : vector<2x384xf32> to vector<2x128xf32>
    %23 = vector.extract_strided_slice %19 {offsets = [0, 128], sizes = [2, 128], strides = [1, 1]} : vector<2x384xf32> to vector<2x128xf32>
    %24 = vector.extract_strided_slice %19 {offsets = [0, 256], sizes = [2, 128], strides = [1, 1]} : vector<2x384xf32> to vector<2x128xf32>
    %25 = arith.mulf %23, %10 : vector<2x128xf32>
    %26 = arith.mulf %22, %21 : vector<2x128xf32>
    %27 = arith.addf %25, %26 : vector<2x128xf32>
    %28 = math.tanh %27 : vector<2x128xf32>
    %29 = arith.mulf %24, %28 : vector<2x128xf32>
    %30 = vector.extract_strided_slice %7 {offsets = [2, 0], sizes = [2, 512], strides = [1, 1]} : vector<16x512xf32> to vector<2x512xf32>
    %cst_9 = arith.constant dense<0.000000e+00> : vector<2x512xf32>
    %31 = tpu.matmul %29, %8, %cst_9 {dimension_numbers = #tpu.dot_dimension_numbers<[1], [0], [0], [1], [0, 0, 1, 1], [], []>} : vector<2x128xf32>, vector<128x512xf32>, vector<2x512xf32> -> vector<2x512xf32>
    %32 = arith.addf %30, %31 : vector<2x512xf32>
    %33 = vector.extract_strided_slice %32 {offsets = [0, 0], sizes = [2, 384], strides = [1, 1]} : vector<2x512xf32> to vector<2x384xf32>
    %34 = arith.negf %33 : vector<2x384xf32>
    %35 = math.exp %34 : vector<2x384xf32>
    %cst_10 = arith.constant 1.000000e+00 : f32
    %36 = vector.broadcast %cst_10 : f32 to vector<2x384xf32>
    %37 = arith.addf %36, %35 : vector<2x384xf32>
    %38 = arith.divf %36, %37 : vector<2x384xf32>
    %39 = vector.extract_strided_slice %32 {offsets = [0, 384], sizes = [2, 128], strides = [1, 1]} : vector<2x512xf32> to vector<2x128xf32>
    %40 = math.tanh %39 : vector<2x128xf32>
    %41 = vector.extract_strided_slice %38 {offsets = [0, 0], sizes = [2, 128], strides = [1, 1]} : vector<2x384xf32> to vector<2x128xf32>
    %42 = vector.extract_strided_slice %38 {offsets = [0, 128], sizes = [2, 128], strides = [1, 1]} : vector<2x384xf32> to vector<2x128xf32>
    %43 = vector.extract_strided_slice %38 {offsets = [0, 256], sizes = [2, 128], strides = [1, 1]} : vector<2x384xf32> to vector<2x128xf32>
    %44 = arith.mulf %42, %27 : vector<2x128xf32>
    %45 = arith.mulf %41, %40 : vector<2x128xf32>
    %46 = arith.addf %44, %45 : vector<2x128xf32>
    %47 = math.tanh %46 : vector<2x128xf32>
    %48 = arith.mulf %43, %47 : vector<2x128xf32>
    %49 = vector.extract_strided_slice %7 {offsets = [4, 0], sizes = [2, 512], strides = [1, 1]} : vector<16x512xf32> to vector<2x512xf32>
    %cst_11 = arith.constant dense<0.000000e+00> : vector<2x512xf32>
    %50 = tpu.matmul %48, %8, %cst_11 {dimension_numbers = #tpu.dot_dimension_numbers<[1], [0], [0], [1], [0, 0, 1, 1], [], []>} : vector<2x128xf32>, vector<128x512xf32>, vector<2x512xf32> -> vector<2x512xf32>
    %51 = arith.addf %49, %50 : vector<2x512xf32>
    %52 = vector.extract_strided_slice %51 {offsets = [0, 0], sizes = [2, 384], strides = [1, 1]} : vector<2x512xf32> to vector<2x384xf32>
    %53 = arith.negf %52 : vector<2x384xf32>
    %54 = math.exp %53 : vector<2x384xf32>
    %cst_12 = arith.constant 1.000000e+00 : f32
    %55 = vector.broadcast %cst_12 : f32 to vector<2x384xf32>
    %56 = arith.addf %55, %54 : vector<2x384xf32>
    %57 = arith.divf %55, %56 : vector<2x384xf32>
    %58 = vector.extract_strided_slice %51 {offsets = [0, 384], sizes = [2, 128], strides = [1, 1]} : vector<2x512xf32> to vector<2x128xf32>
    %59 = math.tanh %58 : vector<2x128xf32>
    %60 = vector.extract_strided_slice %57 {offsets = [0, 0], sizes = [2, 128], strides = [1, 1]} : vector<2x384xf32> to vector<2x128xf32>
    %61 = vector.extract_strided_slice %57 {offsets = [0, 128], sizes = [2, 128], strides = [1, 1]} : vector<2x384xf32> to vector<2x128xf32>
    %62 = vector.extract_strided_slice %57 {offsets = [0, 256], sizes = [2, 128], strides = [1, 1]} : vector<2x384xf32> to vector<2x128xf32>
    %63 = arith.mulf %61, %46 : vector<2x128xf32>
    %64 = arith.mulf %60, %59 : vector<2x128xf32>
    %65 = arith.addf %63, %64 : vector<2x128xf32>
    %66 = math.tanh %65 : vector<2x128xf32>
    %67 = arith.mulf %62, %66 : vector<2x128xf32>
    %68 = vector.extract_strided_slice %7 {offsets = [6, 0], sizes = [2, 512], strides = [1, 1]} : vector<16x512xf32> to vector<2x512xf32>
    %cst_13 = arith.constant dense<0.000000e+00> : vector<2x512xf32>
    %69 = tpu.matmul %67, %8, %cst_13 {dimension_numbers = #tpu.dot_dimension_numbers<[1], [0], [0], [1], [0, 0, 1, 1], [], []>} : vector<2x128xf32>, vector<128x512xf32>, vector<2x512xf32> -> vector<2x512xf32>
    %70 = arith.addf %68, %69 : vector<2x512xf32>
    %71 = vector.extract_strided_slice %70 {offsets = [0, 0], sizes = [2, 384], strides = [1, 1]} : vector<2x512xf32> to vector<2x384xf32>
    %72 = arith.negf %71 : vector<2x384xf32>
    %73 = math.exp %72 : vector<2x384xf32>
    %cst_14 = arith.constant 1.000000e+00 : f32
    %74 = vector.broadcast %cst_14 : f32 to vector<2x384xf32>
    %75 = arith.addf %74, %73 : vector<2x384xf32>
    %76 = arith.divf %74, %75 : vector<2x384xf32>
    %77 = vector.extract_strided_slice %70 {offsets = [0, 384], sizes = [2, 128], strides = [1, 1]} : vector<2x512xf32> to vector<2x128xf32>
    %78 = math.tanh %77 : vector<2x128xf32>
    %79 = vector.extract_strided_slice %76 {offsets = [0, 0], sizes = [2, 128], strides = [1, 1]} : vector<2x384xf32> to vector<2x128xf32>
    %80 = vector.extract_strided_slice %76 {offsets = [0, 128], sizes = [2, 128], strides = [1, 1]} : vector<2x384xf32> to vector<2x128xf32>
    %81 = vector.extract_strided_slice %76 {offsets = [0, 256], sizes = [2, 128], strides = [1, 1]} : vector<2x384xf32> to vector<2x128xf32>
    %82 = arith.mulf %80, %65 : vector<2x128xf32>
    %83 = arith.mulf %79, %78 : vector<2x128xf32>
    %84 = arith.addf %82, %83 : vector<2x128xf32>
    %85 = math.tanh %84 : vector<2x128xf32>
    %86 = arith.mulf %81, %85 : vector<2x128xf32>
    %87 = vector.extract_strided_slice %7 {offsets = [8, 0], sizes = [2, 512], strides = [1, 1]} : vector<16x512xf32> to vector<2x512xf32>
    %cst_15 = arith.constant dense<0.000000e+00> : vector<2x512xf32>
    %88 = tpu.matmul %86, %8, %cst_15 {dimension_numbers = #tpu.dot_dimension_numbers<[1], [0], [0], [1], [0, 0, 1, 1], [], []>} : vector<2x128xf32>, vector<128x512xf32>, vector<2x512xf32> -> vector<2x512xf32>
    %89 = arith.addf %87, %88 : vector<2x512xf32>
    %90 = vector.extract_strided_slice %89 {offsets = [0, 0], sizes = [2, 384], strides = [1, 1]} : vector<2x512xf32> to vector<2x384xf32>
    %91 = arith.negf %90 : vector<2x384xf32>
    %92 = math.exp %91 : vector<2x384xf32>
    %cst_16 = arith.constant 1.000000e+00 : f32
    %93 = vector.broadcast %cst_16 : f32 to vector<2x384xf32>
    %94 = arith.addf %93, %92 : vector<2x384xf32>
    %95 = arith.divf %93, %94 : vector<2x384xf32>
    %96 = vector.extract_strided_slice %89 {offsets = [0, 384], sizes = [2, 128], strides = [1, 1]} : vector<2x512xf32> to vector<2x128xf32>
    %97 = math.tanh %96 : vector<2x128xf32>
    %98 = vector.extract_strided_slice %95 {offsets = [0, 0], sizes = [2, 128], strides = [1, 1]} : vector<2x384xf32> to vector<2x128xf32>
    %99 = vector.extract_strided_slice %95 {offsets = [0, 128], sizes = [2, 128], strides = [1, 1]} : vector<2x384xf32> to vector<2x128xf32>
    %100 = vector.extract_strided_slice %95 {offsets = [0, 256], sizes = [2, 128], strides = [1, 1]} : vector<2x384xf32> to vector<2x128xf32>
    %101 = arith.mulf %99, %84 : vector<2x128xf32>
    %102 = arith.mulf %98, %97 : vector<2x128xf32>
    %103 = arith.addf %101, %102 : vector<2x128xf32>
    %104 = math.tanh %103 : vector<2x128xf32>
    %105 = arith.mulf %100, %104 : vector<2x128xf32>
    %106 = vector.extract_strided_slice %7 {offsets = [10, 0], sizes = [2, 512], strides = [1, 1]} : vector<16x512xf32> to vector<2x512xf32>
    %cst_17 = arith.constant dense<0.000000e+00> : vector<2x512xf32>
    %107 = tpu.matmul %105, %8, %cst_17 {dimension_numbers = #tpu.dot_dimension_numbers<[1], [0], [0], [1], [0, 0, 1, 1], [], []>} : vector<2x128xf32>, vector<128x512xf32>, vector<2x512xf32> -> vector<2x512xf32>
    %108 = arith.addf %106, %107 : vector<2x512xf32>
    %109 = vector.extract_strided_slice %108 {offsets = [0, 0], sizes = [2, 384], strides = [1, 1]} : vector<2x512xf32> to vector<2x384xf32>
    %110 = arith.negf %109 : vector<2x384xf32>
    %111 = math.exp %110 : vector<2x384xf32>
    %cst_18 = arith.constant 1.000000e+00 : f32
    %112 = vector.broadcast %cst_18 : f32 to vector<2x384xf32>
    %113 = arith.addf %112, %111 : vector<2x384xf32>
    %114 = arith.divf %112, %113 : vector<2x384xf32>
    %115 = vector.extract_strided_slice %108 {offsets = [0, 384], sizes = [2, 128], strides = [1, 1]} : vector<2x512xf32> to vector<2x128xf32>
    %116 = math.tanh %115 : vector<2x128xf32>
    %117 = vector.extract_strided_slice %114 {offsets = [0, 0], sizes = [2, 128], strides = [1, 1]} : vector<2x384xf32> to vector<2x128xf32>
    %118 = vector.extract_strided_slice %114 {offsets = [0, 128], sizes = [2, 128], strides = [1, 1]} : vector<2x384xf32> to vector<2x128xf32>
    %119 = vector.extract_strided_slice %114 {offsets = [0, 256], sizes = [2, 128], strides = [1, 1]} : vector<2x384xf32> to vector<2x128xf32>
    %120 = arith.mulf %118, %103 : vector<2x128xf32>
    %121 = arith.mulf %117, %116 : vector<2x128xf32>
    %122 = arith.addf %120, %121 : vector<2x128xf32>
    %123 = math.tanh %122 : vector<2x128xf32>
    %124 = arith.mulf %119, %123 : vector<2x128xf32>
    %125 = vector.extract_strided_slice %7 {offsets = [12, 0], sizes = [2, 512], strides = [1, 1]} : vector<16x512xf32> to vector<2x512xf32>
    %cst_19 = arith.constant dense<0.000000e+00> : vector<2x512xf32>
    %126 = tpu.matmul %124, %8, %cst_19 {dimension_numbers = #tpu.dot_dimension_numbers<[1], [0], [0], [1], [0, 0, 1, 1], [], []>} : vector<2x128xf32>, vector<128x512xf32>, vector<2x512xf32> -> vector<2x512xf32>
    %127 = arith.addf %125, %126 : vector<2x512xf32>
    %128 = vector.extract_strided_slice %127 {offsets = [0, 0], sizes = [2, 384], strides = [1, 1]} : vector<2x512xf32> to vector<2x384xf32>
    %129 = arith.negf %128 : vector<2x384xf32>
    %130 = math.exp %129 : vector<2x384xf32>
    %cst_20 = arith.constant 1.000000e+00 : f32
    %131 = vector.broadcast %cst_20 : f32 to vector<2x384xf32>
    %132 = arith.addf %131, %130 : vector<2x384xf32>
    %133 = arith.divf %131, %132 : vector<2x384xf32>
    %134 = vector.extract_strided_slice %127 {offsets = [0, 384], sizes = [2, 128], strides = [1, 1]} : vector<2x512xf32> to vector<2x128xf32>
    %135 = math.tanh %134 : vector<2x128xf32>
    %136 = vector.extract_strided_slice %133 {offsets = [0, 0], sizes = [2, 128], strides = [1, 1]} : vector<2x384xf32> to vector<2x128xf32>
    %137 = vector.extract_strided_slice %133 {offsets = [0, 128], sizes = [2, 128], strides = [1, 1]} : vector<2x384xf32> to vector<2x128xf32>
    %138 = vector.extract_strided_slice %133 {offsets = [0, 256], sizes = [2, 128], strides = [1, 1]} : vector<2x384xf32> to vector<2x128xf32>
    %139 = arith.mulf %137, %122 : vector<2x128xf32>
    %140 = arith.mulf %136, %135 : vector<2x128xf32>
    %141 = arith.addf %139, %140 : vector<2x128xf32>
    %142 = math.tanh %141 : vector<2x128xf32>
    %143 = arith.mulf %138, %142 : vector<2x128xf32>
    %144 = vector.extract_strided_slice %7 {offsets = [14, 0], sizes = [2, 512], strides = [1, 1]} : vector<16x512xf32> to vector<2x512xf32>
    %cst_21 = arith.constant dense<0.000000e+00> : vector<2x512xf32>
    %145 = tpu.matmul %143, %8, %cst_21 {dimension_numbers = #tpu.dot_dimension_numbers<[1], [0], [0], [1], [0, 0, 1, 1], [], []>} : vector<2x128xf32>, vector<128x512xf32>, vector<2x512xf32> -> vector<2x512xf32>
    %146 = arith.addf %144, %145 : vector<2x512xf32>
    %147 = vector.extract_strided_slice %146 {offsets = [0, 0], sizes = [2, 384], strides = [1, 1]} : vector<2x512xf32> to vector<2x384xf32>
    %148 = arith.negf %147 : vector<2x384xf32>
    %149 = math.exp %148 : vector<2x384xf32>
    %cst_22 = arith.constant 1.000000e+00 : f32
    %150 = vector.broadcast %cst_22 : f32 to vector<2x384xf32>
    %151 = arith.addf %150, %149 : vector<2x384xf32>
    %152 = arith.divf %150, %151 : vector<2x384xf32>
    %153 = vector.extract_strided_slice %146 {offsets = [0, 384], sizes = [2, 128], strides = [1, 1]} : vector<2x512xf32> to vector<2x128xf32>
    %154 = math.tanh %153 : vector<2x128xf32>
    %155 = vector.extract_strided_slice %152 {offsets = [0, 0], sizes = [2, 128], strides = [1, 1]} : vector<2x384xf32> to vector<2x128xf32>
    %156 = vector.extract_strided_slice %152 {offsets = [0, 128], sizes = [2, 128], strides = [1, 1]} : vector<2x384xf32> to vector<2x128xf32>
    %157 = vector.extract_strided_slice %152 {offsets = [0, 256], sizes = [2, 128], strides = [1, 1]} : vector<2x384xf32> to vector<2x128xf32>
    %158 = arith.mulf %156, %141 : vector<2x128xf32>
    %159 = arith.mulf %155, %154 : vector<2x128xf32>
    %160 = arith.addf %158, %159 : vector<2x128xf32>
    %161 = math.tanh %160 : vector<2x128xf32>
    %162 = arith.mulf %157, %161 : vector<2x128xf32>
    %c0_23 = arith.constant 0 : index
    %c0_24 = arith.constant 0 : index
    %c0_25 = arith.constant 0 : index
    %163 = vector.load %arg3[%c0_23, %c0_24, %c0_25] : memref<2x2x128xf32, #tpu.memory_space<vmem>>, vector<1x2x128xf32>
    %164 = vector.shape_cast %163 : vector<1x2x128xf32> to vector<2x128xf32>
    %165 = vector.shape_cast %162 : vector<2x128xf32> to vector<1x2x128xf32>
    tpu.vector_store %arg3[%c0_23, %c0_24, %c0_25], %165 {strides = array<i32>} : memref<2x2x128xf32, #tpu.memory_space<vmem>>, vector<1x2x128xf32>,
    %c1 = arith.constant 1 : index
    %c0_26 = arith.constant 0 : index
    %c0_27 = arith.constant 0 : index
    %166 = vector.load %arg3[%c1, %c0_26, %c0_27] : memref<2x2x128xf32, #tpu.memory_space<vmem>>, vector<1x2x128xf32>
    %167 = vector.shape_cast %166 : vector<1x2x128xf32> to vector<2x128xf32>
    %168 = vector.shape_cast %160 : vector<2x128xf32> to vector<1x2x128xf32>
    tpu.vector_store %arg3[%c1, %c0_26, %c0_27], %168 {strides = array<i32>} : memref<2x2x128xf32, #tpu.memory_space<vmem>>, vector<1x2x128xf32>,
    return
  }
}

</mosaic_0001>

<bundles_post_ra>
// kernel: tpu_custom_call.1
= control target key start
LH: loop header
LB: loop body
LE: loop exit
PB: predicated region body
PF: predicated region fallthrough
CT: control target
= control target key end

     0   :  { %8 = vsyncpa [#allocation3], 0  ;;  %s3050_s0 = inlined_call_operand.vmem [shape: s32[16,1], index: 0, kind: input, shape index: {}]   ;;  %s3051_s1 = inlined_call_operand.hbm [shape: f32[256,512], index: 1, kind: input, shape index: {}]   ;;  %s3052_s2 = inlined_call_operand.hbm [shape: f32[128,512], index: 2, kind: input, shape index: {}]   ;;  %s3053_s3 = inlined_call_operand.hbm [shape: f32[2,2,128], index: 3, kind: output, shape index: {}]  }
   0x1   :  { %9 = vsyncpa [#allocation6], 0 }
   0x2   :  { %10 = vsyncpa [#allocation4], 0  ;;  %s17_s14 = sshll.u32 %s3051_s1, 4  ;;  %s2077_s15 = smov [#allocation2]   ;;  %s18_s14 = int_to_ptr.hbm [resolvable:$true] %s17_s14 }
   0x3   :  { %s19_s16 = sshll.u32 %s2077_s15, 4  ;;  %s30_s19 = sshll.u32 %s3052_s2, 4  ;;  %s20_s16 = int_to_ptr.vmem [resolvable:$true] %s19_s16  ;;  %s31_s19 = int_to_ptr.hbm [resolvable:$true] %s30_s19 }
   0x4   :  { %s2078_s20 = smov 512   ;;  %s2079_s21 = smov 32  }
   0x5   :  { %25 = dma.hbm_to_vmem [thread:$0]  %s18_s14, 16384, %s20_s16, [#allocation3], %s2078_s20, %s2078_s20, %s2079_s21  }
   0x6   :  { %s2080_s22 = smov [#allocation5]  }
   0x7   :  { %s32_s23 = sshll.u32 %s2080_s22, 4  ;;  %s33_s23 = int_to_ptr.vmem [resolvable:$true] %s32_s23 }
   0x8   :  { %38 = dma.hbm_to_vmem [thread:$0]  %s31_s19, 8192, %s33_s23, [#allocation6], %s2078_s20, %s2078_s20, %s2079_s21  }
   0x9   :  { %2071 = dma.done.wait [#allocation3], 16384  }
   0xa   :  { %2072 = vsyncadd [#allocation3], 4294950912 }
   0xb   :  { %2073 = dma.done.wait [#allocation6], 8192  }
   0xc   :  { %2074 = vsyncadd [#allocation6], 4294959104  ;;  %v2081_v0 = vmov 0   ;;  %v50_v1 = vld [vmem:[%s3050_s0] sm:$0xff]  ;;  %v131_v4 = vld [vmem:[#allocation2 + $0x1e8] sm:$0xff]  ;;  %s1739_s29 = sshll.u32 %s3053_s3, 4  ;;  %s1740_s29 = int_to_ptr.hbm [resolvable:$true] %s1739_s29 }
   0xd   :  { %1806 = vset.pattern.permute.xlu0 %v2081_v0  ;;  %v130_v2 = vld [vmem:[#allocation2 + $0x1e0] sm:$0xff]  ;;  %v195_v5 = vld [vmem:[#allocation2 + $0x3e8] sm:$0xff]  ;;  %244 = vmatpush.msra.mxu2 %v131_v4  ;;  %v196_v4 = vld [vmem:[#allocation2 + $0x3f0] sm:$0xff]  ;;  %s2085_s30 = smov 2  }
   0xe   :  { %53 = vperm.xlu0 %1806, %v50_v1   ;;  %198 = vmatpush.msra.mxu0 %v130_v2  ;;  %v194_v3 = vld [vmem:[#allocation2 + $0x3e0] sm:$0xff]  ;;  %v127_v8 = vld [vmem:[#allocation2 + $0x1c8] sm:$0xff] }
   0xf   :  { %221 = vmatpush.msra.mxu1 %v194_v3  ;;  %v126_v6 = vld [vmem:[#allocation2 + $0x1c0] sm:$0xff]  ;;  %267 = vmatpush.msra.mxu3 %v195_v5  ;;  %v191_v9 = vld [vmem:[#allocation2 + $0x3c8] sm:$0xff]  ;;  %v132_v3 = vld [vmem:[#allocation2 + $0x1f0] sm:$0xff] }
  0x10   :  { %v190_v7 = vld [vmem:[#allocation2 + $0x3c0] sm:$0xff]  ;;  %199 = vmatpush.msra.mxu0 %v126_v6  ;;  %245 = vmatpush.msra.mxu2 %v127_v8  ;;  %v123_v12 = vld [vmem:[#allocation2 + $0x1a8] sm:$0xff]  ;;  %v133_v5 = vld [vmem:[#allocation2 + $0x1f8] sm:$0xff] }
  0x11   :  { %v122_v10 = vld [vmem:[#allocation2 + $0x1a0] sm:$0xff]  ;;  %222 = vmatpush.msra.mxu1 %v190_v7  ;;  %v187_v13 = vld [vmem:[#allocation2 + $0x3a8] sm:$0xff]  ;;  %268 = vmatpush.msra.mxu3 %v191_v9  ;;  %v197_v6 = vld [vmem:[#allocation2 + $0x3f8] sm:$0xff] }
  0x12   :  { %v186_v11 = vld [vmem:[#allocation2 + $0x3a0] sm:$0xff]  ;;  %200 = vmatpush.msra.mxu0 %v122_v10  ;;  %v119_v16 = vld [vmem:[#allocation2 + $0x188] sm:$0xff]  ;;  %246 = vmatpush.msra.mxu2 %v123_v12  ;;  %v128_v7 = vld [vmem:[#allocation2 + $0x1d0] sm:$0xff] }
  0x13   :  { %v118_v14 = vld [vmem:[#allocation2 + $0x180] sm:$0xff]  ;;  %v51_v17 = vld [vmem:[%s3050_s0 + $0x8] sm:$0xff]  ;;  %223 = vmatpush.msra.mxu1 %v186_v11  ;;  %269 = vmatpush.msra.mxu3 %v187_v13  ;;  %v192_v8 = vld [vmem:[#allocation2 + $0x3d0] sm:$0xff]  ;;  %s2084_s0 = smov [#allocation7]  }
  0x14   :  { %v182_v15 = vld [vmem:[#allocation2 + $0x380] sm:$0xff]  ;;  %v183_v18 = vld [vmem:[#allocation2 + $0x388] sm:$0xff]  ;;  %201 = vmatpush.msra.mxu0 %v118_v14  ;;  %247 = vmatpush.msra.mxu2 %v119_v16  ;;  %v129_v9 = vld [vmem:[#allocation2 + $0x1d8] sm:$0xff]  ;;  %s1737_s26 = sshll.u32 %s2084_s0, 4  ;;  %s1738_s26 = int_to_ptr.vmem [resolvable:$true] %s1737_s26 }
  0x15   :  { %v114_v19 = vld [vmem:[#allocation2 + $0x160] sm:$0xff]  ;;  %224 = vmatpush.msra.mxu1 %v182_v15  ;;  %v115_v21 = vld [vmem:[#allocation2 + $0x168] sm:$0xff]  ;;  %270 = vmatpush.msra.mxu3 %v183_v18  ;;  %v193_v10 = vld [vmem:[#allocation2 + $0x3d8] sm:$0xff] }
  0x16   :  { %v178_v20 = vld [vmem:[#allocation2 + $0x360] sm:$0xff]  ;;  %v179_v22 = vld [vmem:[#allocation2 + $0x368] sm:$0xff]  ;;  %56 = vperm.xlu0 %1806, %v51_v17   ;;  %202 = vmatpush.msra.mxu0 %v114_v19  ;;  %v124_v11 = vld [vmem:[#allocation2 + $0x1b0] sm:$0xff] }
  0x17   :  { %v110_v23 = vld [vmem:[#allocation2 + $0x140] sm:$0xff]  ;;  %225 = vmatpush.msra.mxu1 %v178_v20  ;;  %v111_v25 = vld [vmem:[#allocation2 + $0x148] sm:$0xff]  ;;  %248 = vmatpush.msra.mxu2 %v115_v21  ;;  %v188_v12 = vld [vmem:[#allocation2 + $0x3b0] sm:$0xff] }
  0x18   :  { %v174_v24 = vld [vmem:[#allocation2 + $0x340] sm:$0xff]  ;;  %v175_v26 = vld [vmem:[#allocation2 + $0x348] sm:$0xff]  ;;  %271 = vmatpush.msra.mxu3 %v179_v22  ;;  %203 = vmatpush.msra.mxu0 %v110_v23  ;;  %v125_v13 = vld [vmem:[#allocation2 + $0x1b8] sm:$0xff] }
  0x19   :  { %v106_v27 = vld [vmem:[#allocation2 + $0x120] sm:$0xff]  ;;  %226 = vmatpush.msra.mxu1 %v174_v24  ;;  %v107_v29 = vld [vmem:[#allocation2 + $0x128] sm:$0xff]  ;;  %249 = vmatpush.msra.mxu2 %v111_v25  ;;  %v189_v14 = vld [vmem:[#allocation2 + $0x3b8] sm:$0xff] }
  0x1a   :  { %v170_v28 = vld [vmem:[#allocation2 + $0x320] sm:$0xff]  ;;  %v171_v30 = vld [vmem:[#allocation2 + $0x328] sm:$0xff]  ;;  %272 = vmatpush.msra.mxu3 %v175_v26  ;;  %204 = vmatpush.msra.mxu0 %v106_v27  ;;  %v120_v15 = vld [vmem:[#allocation2 + $0x190] sm:$0xff] }
  0x1b   :  { %v102_v31 = vld [vmem:[#allocation2 + $0x100] sm:$0xff]  ;;  %227 = vmatpush.msra.mxu1 %v170_v28  ;;  %v103_v33 = vld [vmem:[#allocation2 + $0x108] sm:$0xff]  ;;  %250 = vmatpush.msra.mxu2 %v107_v29  ;;  %v184_v16 = vld [vmem:[#allocation2 + $0x390] sm:$0xff] }
  0x1c   :  { %v166_v32 = vld [vmem:[#allocation2 + $0x300] sm:$0xff]  ;;  %v167_v34 = vld [vmem:[#allocation2 + $0x308] sm:$0xff]  ;;  %273 = vmatpush.msra.mxu3 %v171_v30  ;;  %205 = vmatpush.msra.mxu0 %v102_v31  ;;  %v121_v17 = vld [vmem:[#allocation2 + $0x198] sm:$0xff] }
  0x1d   :  { %v98_v35 = vld [vmem:[#allocation2 + $0xe0] sm:$0xff]  ;;  %228 = vmatpush.msra.mxu1 %v166_v32  ;;  %v99_v37 = vld [vmem:[#allocation2 + $0xe8] sm:$0xff]  ;;  %251 = vmatpush.msra.mxu2 %v103_v33  ;;  %v185_v18 = vld [vmem:[#allocation2 + $0x398] sm:$0xff] }
  0x1e   :  { %v162_v36 = vld [vmem:[#allocation2 + $0x2e0] sm:$0xff]  ;;  %v163_v38 = vld [vmem:[#allocation2 + $0x2e8] sm:$0xff]  ;;  %274 = vmatpush.msra.mxu3 %v167_v34  ;;  %206 = vmatpush.msra.mxu0 %v98_v35  ;;  %v116_v19 = vld [vmem:[#allocation2 + $0x170] sm:$0xff] }
  0x1f   :  { %v94_v39 = vld [vmem:[#allocation2 + $0xc0] sm:$0xff]  ;;  %229 = vmatpush.msra.mxu1 %v162_v36  ;;  %v95_v41 = vld [vmem:[#allocation2 + $0xc8] sm:$0xff]  ;;  %252 = vmatpush.msra.mxu2 %v99_v37  ;;  %v180_v20 = vld [vmem:[#allocation2 + $0x370] sm:$0xff] }
  0x20   :  { %v158_v40 = vld [vmem:[#allocation2 + $0x2c0] sm:$0xff]  ;;  %v159_v42 = vld [vmem:[#allocation2 + $0x2c8] sm:$0xff]  ;;  %275 = vmatpush.msra.mxu3 %v163_v38  ;;  %207 = vmatpush.msra.mxu0 %v94_v39  ;;  %v117_v21 = vld [vmem:[#allocation2 + $0x178] sm:$0xff] }
  0x21   :  { %v90_v43 = vld [vmem:[#allocation2 + $0xa0] sm:$0xff]  ;;  %230 = vmatpush.msra.mxu1 %v158_v40  ;;  %v91_v45 = vld [vmem:[#allocation2 + $0xa8] sm:$0xff]  ;;  %253 = vmatpush.msra.mxu2 %v95_v41  ;;  %v181_v22 = vld [vmem:[#allocation2 + $0x378] sm:$0xff] }
  0x22   :  { %v154_v44 = vld [vmem:[#allocation2 + $0x2a0] sm:$0xff]  ;;  %v155_v46 = vld [vmem:[#allocation2 + $0x2a8] sm:$0xff]  ;;  %276 = vmatpush.msra.mxu3 %v159_v42  ;;  %208 = vmatpush.msra.mxu0 %v90_v43  ;;  %v112_v23 = vld [vmem:[#allocation2 + $0x150] sm:$0xff] }
  0x23   :  { %v86_v47 = vld [vmem:[#allocation2 + $0x80] sm:$0xff]  ;;  %231 = vmatpush.msra.mxu1 %v154_v44  ;;  %v87_v49 = vld [vmem:[#allocation2 + $0x88] sm:$0xff]  ;;  %254 = vmatpush.msra.mxu2 %v91_v45  ;;  %v176_v24 = vld [vmem:[#allocation2 + $0x350] sm:$0xff] }
  0x24   :  { %v150_v48 = vld [vmem:[#allocation2 + $0x280] sm:$0xff]  ;;  %v151_v50 = vld [vmem:[#allocation2 + $0x288] sm:$0xff]  ;;  %277 = vmatpush.msra.mxu3 %v155_v46  ;;  %209 = vmatpush.msra.mxu0 %v86_v47  ;;  %v113_v25 = vld [vmem:[#allocation2 + $0x158] sm:$0xff] }
  0x25   :  { %v82_v51 = vld [vmem:[#allocation2 + $0x60] sm:$0xff]  ;;  %232 = vmatpush.msra.mxu1 %v150_v48  ;;  %v83_v53 = vld [vmem:[#allocation2 + $0x68] sm:$0xff]  ;;  %255 = vmatpush.msra.mxu2 %v87_v49  ;;  %v177_v26 = vld [vmem:[#allocation2 + $0x358] sm:$0xff] }
  0x26   :  { %v146_v52 = vld [vmem:[#allocation2 + $0x260] sm:$0xff]  ;;  %v147_v54 = vld [vmem:[#allocation2 + $0x268] sm:$0xff]  ;;  %278 = vmatpush.msra.mxu3 %v151_v50  ;;  %210 = vmatpush.msra.mxu0 %v82_v51  ;;  %v108_v27 = vld [vmem:[#allocation2 + $0x130] sm:$0xff] }
  0x27   :  { %v78_v55 = vld [vmem:[#allocation2 + $0x40] sm:$0xff]  ;;  %233 = vmatpush.msra.mxu1 %v146_v52  ;;  %v79_v57 = vld [vmem:[#allocation2 + $0x48] sm:$0xff]  ;;  %256 = vmatpush.msra.mxu2 %v83_v53  ;;  %v172_v28 = vld [vmem:[#allocation2 + $0x330] sm:$0xff] }
  0x28   :  { %v142_v56 = vld [vmem:[#allocation2 + $0x240] sm:$0xff]  ;;  %v143_v58 = vld [vmem:[#allocation2 + $0x248] sm:$0xff]  ;;  %279 = vmatpush.msra.mxu3 %v147_v54  ;;  %211 = vmatpush.msra.mxu0 %v78_v55  ;;  %v109_v29 = vld [vmem:[#allocation2 + $0x138] sm:$0xff] }
  0x29   :  { %v74_v59 = vld [vmem:[#allocation2 + $0x20] sm:$0xff]  ;;  %234 = vmatpush.msra.mxu1 %v142_v56  ;;  %v75_v61 = vld [vmem:[#allocation2 + $0x28] sm:$0xff]  ;;  %257 = vmatpush.msra.mxu2 %v79_v57  ;;  %v173_v30 = vld [vmem:[#allocation2 + $0x338] sm:$0xff] }
  0x2a   :  { %v138_v60 = vld [vmem:[#allocation2 + $0x220] sm:$0xff]  ;;  %v139_v62 = vld [vmem:[#allocation2 + $0x228] sm:$0xff]  ;;  %280 = vmatpush.msra.mxu3 %v143_v58  ;;  %212 = vmatpush.msra.mxu0 %v74_v59  ;;  %v104_v31 = vld [vmem:[#allocation2 + $0x110] sm:$0xff] }
  0x2b   :  { %v70_v63 = vld [vmem:[#allocation2] sm:$0xff]  ;;  %235 = vmatpush.msra.mxu1 %v138_v60  ;;  %v71_v1 = vld [vmem:[#allocation2 + $0x8] sm:$0xff]  ;;  %258 = vmatpush.msra.mxu2 %v75_v61  ;;  %v168_v32 = vld [vmem:[#allocation2 + $0x310] sm:$0xff] }
  0x2c   :  { %v134_v0 = vld [vmem:[#allocation2 + $0x200] sm:$0xff]  ;;  %v135_v2 = vld [vmem:[#allocation2 + $0x208] sm:$0xff]  ;;  %281 = vmatpush.msra.mxu3 %v139_v62  ;;  %213 = vmatpush.msra.mxu0 %v70_v63  ;;  %v105_v33 = vld [vmem:[#allocation2 + $0x118] sm:$0xff] }
  0x2d   :  { %236 = vmatpush.msra.mxu1 %v134_v0  ;;  %259 = vmatpush.msra.mxu2 %v71_v1  ;;  %v169_v34 = vld [vmem:[#allocation2 + $0x318] sm:$0xff]  ;;  %v100_v35 = vld [vmem:[#allocation2 + $0xf0] sm:$0xff] }
  0x2e   :  { %282 = vmatpush.msra.mxu3 %v135_v2  ;;  %290 = vmatpush.msrb.mxu0 %v132_v3  ;;  %v164_v36 = vld [vmem:[#allocation2 + $0x2f0] sm:$0xff]  ;;  %v101_v37 = vld [vmem:[#allocation2 + $0xf8] sm:$0xff]  ;;  %v47_v3 = vlaneseq }
  0x2f   :  { %313 = vmatpush.msrb.mxu1 %v196_v4  ;;  %336 = vmatpush.msrb.mxu2 %v133_v5  ;;  %v165_v38 = vld [vmem:[#allocation2 + $0x2f8] sm:$0xff]  ;;  %v96_v39 = vld [vmem:[#allocation2 + $0xd0] sm:$0xff] }
  0x30   :  { %359 = vmatpush.msrb.mxu3 %v197_v6  ;;  %291 = vmatpush.msrb.mxu0 %v128_v7  ;;  %v160_v40 = vld [vmem:[#allocation2 + $0x2d0] sm:$0xff]  ;;  %v97_v41 = vld [vmem:[#allocation2 + $0xd8] sm:$0xff]  ;;  %v2120_v4 = vand.u32 127, %v47_v3  ;;  %v2131_v7 = vld [vmem:[#allocation5 + $0x1e0] sm:$0xff] }
  0x31   :  { %314 = vmatpush.msrb.mxu1 %v192_v8  ;;  %337 = vmatpush.msrb.mxu2 %v129_v9  ;;  %v161_v42 = vld [vmem:[#allocation2 + $0x2d8] sm:$0xff]  ;;  %v92_v43 = vld [vmem:[#allocation2 + $0xb0] sm:$0xff]  ;;  %v2133_v8 = vld [vmem:[#allocation5 + $0x1e8] sm:$0xff]  ;;  %v2082_v9 = vmov 1.0  }
  0x32   :  { %360 = vmatpush.msrb.mxu3 %v193_v10  ;;  %292 = vmatpush.msrb.mxu0 %v124_v11  ;;  %v156_v44 = vld [vmem:[#allocation2 + $0x2b0] sm:$0xff]  ;;  %v93_v45 = vld [vmem:[#allocation2 + $0xb8] sm:$0xff]  ;;  %v2123_v5 = vadd.s32 128, %v2120_v4 }
  0x33   :  { %315 = vmatpush.msrb.mxu1 %v188_v12  ;;  %338 = vmatpush.msrb.mxu2 %v125_v13  ;;  %v157_v46 = vld [vmem:[#allocation2 + $0x2b8] sm:$0xff]  ;;  %v88_v47 = vld [vmem:[#allocation2 + $0x90] sm:$0xff]  ;;  %v2155_v12 = vld [vmem:[#allocation5 + $0x1c0] sm:$0xff] }
  0x34   :  { %361 = vmatpush.msrb.mxu3 %v189_v14  ;;  %293 = vmatpush.msrb.mxu0 %v120_v15  ;;  %v152_v48 = vld [vmem:[#allocation2 + $0x290] sm:$0xff]  ;;  %v89_v49 = vld [vmem:[#allocation2 + $0x98] sm:$0xff]  ;;  %v2157_v13 = vld [vmem:[#allocation5 + $0x1c8] sm:$0xff] }
  0x35   :  { %316 = vmatpush.msrb.mxu1 %v184_v16  ;;  %339 = vmatpush.msrb.mxu2 %v121_v17  ;;  %v153_v50 = vld [vmem:[#allocation2 + $0x298] sm:$0xff]  ;;  %v84_v51 = vld [vmem:[#allocation2 + $0x70] sm:$0xff]  ;;  %v2167_v16 = vld [vmem:[#allocation5 + $0x1a0] sm:$0xff] }
  0x36   :  { %362 = vmatpush.msrb.mxu3 %v185_v18  ;;  %294 = vmatpush.msrb.mxu0 %v116_v19  ;;  %v148_v52 = vld [vmem:[#allocation2 + $0x270] sm:$0xff]  ;;  %v85_v53 = vld [vmem:[#allocation2 + $0x78] sm:$0xff]  ;;  %v2169_v17 = vld [vmem:[#allocation5 + $0x1a8] sm:$0xff] }
  0x37   :  { %317 = vmatpush.msrb.mxu1 %v180_v20  ;;  %340 = vmatpush.msrb.mxu2 %v117_v21  ;;  %v149_v54 = vld [vmem:[#allocation2 + $0x278] sm:$0xff]  ;;  %v80_v55 = vld [vmem:[#allocation2 + $0x50] sm:$0xff]  ;;  %v2179_v20 = vld [vmem:[#allocation5 + $0x180] sm:$0xff] }
  0x38   :  { %363 = vmatpush.msrb.mxu3 %v181_v22  ;;  %295 = vmatpush.msrb.mxu0 %v112_v23  ;;  %v144_v56 = vld [vmem:[#allocation2 + $0x250] sm:$0xff]  ;;  %v81_v57 = vld [vmem:[#allocation2 + $0x58] sm:$0xff]  ;;  %v2181_v21 = vld [vmem:[#allocation5 + $0x188] sm:$0xff] }
  0x39   :  { %318 = vmatpush.msrb.mxu1 %v176_v24  ;;  %341 = vmatpush.msrb.mxu2 %v113_v25  ;;  %v145_v58 = vld [vmem:[#allocation2 + $0x258] sm:$0xff]  ;;  %v76_v59 = vld [vmem:[#allocation2 + $0x30] sm:$0xff]  ;;  %v2201_v25 = vld [vmem:[#allocation5 + $0x160] sm:$0xff] }
  0x3a   :  { %364 = vmatpush.msrb.mxu3 %v177_v26  ;;  %296 = vmatpush.msrb.mxu0 %v108_v27  ;;  %v140_v60 = vld [vmem:[#allocation2 + $0x230] sm:$0xff]  ;;  %v77_v61 = vld [vmem:[#allocation2 + $0x38] sm:$0xff]  ;;  %v2203_v26 = vld [vmem:[#allocation5 + $0x168] sm:$0xff] }
  0x3b   :  { %319 = vmatpush.msrb.mxu1 %v172_v28  ;;  %342 = vmatpush.msrb.mxu2 %v109_v29  ;;  %v141_v62 = vld [vmem:[#allocation2 + $0x238] sm:$0xff]  ;;  %v72_v63 = vld [vmem:[#allocation2 + $0x10] sm:$0xff]  ;;  %v2225_v29 = vld [vmem:[#allocation5 + $0x140] sm:$0xff] }
  0x3c   :  { %365 = vmatpush.msrb.mxu3 %v173_v30  ;;  %297 = vmatpush.msrb.mxu0 %v104_v31  ;;  %v136_v0 = vld [vmem:[#allocation2 + $0x210] sm:$0xff]  ;;  %v73_v1 = vld [vmem:[#allocation2 + $0x18] sm:$0xff]  ;;  %v2227_v30 = vld [vmem:[#allocation5 + $0x148] sm:$0xff] }
  0x3d   :  { %320 = vmatpush.msrb.mxu1 %v168_v32  ;;  %343 = vmatpush.msrb.mxu2 %v105_v33  ;;  %v137_v2 = vld [vmem:[#allocation2 + $0x218] sm:$0xff]  ;;  %v2143_v10 = vld [vmem:[#allocation5 + $0x1f0] sm:$0xff]  ;;  %v2237_v33 = vld [vmem:[#allocation5 + $0x120] sm:$0xff] }
  0x3e   :  { %366 = vmatpush.msrb.mxu3 %v169_v34  ;;  %298 = vmatpush.msrb.mxu0 %v100_v35  ;;  %v2145_v11 = vld [vmem:[#allocation5 + $0x1f8] sm:$0xff]  ;;  %v2161_v14 = vld [vmem:[#allocation5 + $0x1d0] sm:$0xff]  ;;  %v2239_v34 = vld [vmem:[#allocation5 + $0x128] sm:$0xff] }
  0x3f   :  { %321 = vmatpush.msrb.mxu1 %v164_v36  ;;  %344 = vmatpush.msrb.mxu2 %v101_v37  ;;  %v2163_v15 = vld [vmem:[#allocation5 + $0x1d8] sm:$0xff]  ;;  %v2173_v18 = vld [vmem:[#allocation5 + $0x1b0] sm:$0xff]  ;;  %v2249_v37 = vld [vmem:[#allocation5 + $0x100] sm:$0xff] }
  0x40   :  { %367 = vmatpush.msrb.mxu3 %v165_v38  ;;  %299 = vmatpush.msrb.mxu0 %v96_v39  ;;  %v2175_v19 = vld [vmem:[#allocation5 + $0x1b8] sm:$0xff]  ;;  %v2187_v23 = vld [vmem:[#allocation5 + $0x190] sm:$0xff]  ;;  %v2251_v38 = vld [vmem:[#allocation5 + $0x108] sm:$0xff] }
  0x41   :  { %322 = vmatpush.msrb.mxu1 %v160_v40  ;;  %345 = vmatpush.msrb.mxu2 %v97_v41  ;;  %v2189_v24 = vld [vmem:[#allocation5 + $0x198] sm:$0xff]  ;;  %v2213_v27 = vld [vmem:[#allocation5 + $0x170] sm:$0xff]  ;;  %v2265_v41 = vld [vmem:[#allocation5 + $0xe0] sm:$0xff] }
  0x42   :  { %368 = vmatpush.msrb.mxu3 %v161_v42  ;;  %300 = vmatpush.msrb.mxu0 %v92_v43  ;;  %v2215_v28 = vld [vmem:[#allocation5 + $0x178] sm:$0xff]  ;;  %v2231_v31 = vld [vmem:[#allocation5 + $0x150] sm:$0xff]  ;;  %v2267_v42 = vld [vmem:[#allocation5 + $0xe8] sm:$0xff] }
  0x43   :  { %323 = vmatpush.msrb.mxu1 %v156_v44  ;;  %346 = vmatpush.msrb.mxu2 %v93_v45  ;;  %v2233_v32 = vld [vmem:[#allocation5 + $0x158] sm:$0xff]  ;;  %v2243_v35 = vld [vmem:[#allocation5 + $0x130] sm:$0xff]  ;;  %v2289_v45 = vld [vmem:[#allocation5 + $0xc0] sm:$0xff] }
  0x44   :  { %369 = vmatpush.msrb.mxu3 %v157_v46  ;;  %301 = vmatpush.msrb.mxu0 %v88_v47  ;;  %v2245_v36 = vld [vmem:[#allocation5 + $0x138] sm:$0xff]  ;;  %v2255_v39 = vld [vmem:[#allocation5 + $0x110] sm:$0xff]  ;;  %v2291_v46 = vld [vmem:[#allocation5 + $0xc8] sm:$0xff] }
  0x45   :  { %324 = vmatpush.msrb.mxu1 %v152_v48  ;;  %347 = vmatpush.msrb.mxu2 %v89_v49  ;;  %v2257_v40 = vld [vmem:[#allocation5 + $0x118] sm:$0xff]  ;;  %v2277_v43 = vld [vmem:[#allocation5 + $0xf0] sm:$0xff]  ;;  %v2301_v49 = vld [vmem:[#allocation5 + $0xa0] sm:$0xff] }
  0x46   :  { %370 = vmatpush.msrb.mxu3 %v153_v50  ;;  %302 = vmatpush.msrb.mxu0 %v84_v51  ;;  %v2279_v44 = vld [vmem:[#allocation5 + $0xf8] sm:$0xff]  ;;  %v2295_v47 = vld [vmem:[#allocation5 + $0xd0] sm:$0xff]  ;;  %3175 = vst [vmem:[#allocation13_spill] sm:$0xff] %v2301_v49  ;;  %v2303_v50 = vld [vmem:[#allocation5 + $0xa8] sm:$0xff] }
  0x47   :  { %325 = vmatpush.msrb.mxu1 %v148_v52  ;;  %348 = vmatpush.msrb.mxu2 %v85_v53  ;;  %3173 = vst [vmem:[#allocation11_spill] sm:$0xff] %v2295_v47  ;;  %v2297_v48 = vld [vmem:[#allocation5 + $0xd8] sm:$0xff]  ;;  %v2307_v51 = vld [vmem:[#allocation5 + $0xb0] sm:$0xff]  ;;  %v2313_v53 = vld [vmem:[#allocation5 + $0x80] sm:$0xff] }
  0x48   :  { %371 = vmatpush.msrb.mxu3 %v149_v54  ;;  %303 = vmatpush.msrb.mxu0 %v80_v55  ;;  %3174 = vst [vmem:[#allocation12_spill] sm:$0xff] %v2297_v48  ;;  %v2309_v52 = vld [vmem:[#allocation5 + $0xb8] sm:$0xff]  ;;  %v2315_v54 = vld [vmem:[#allocation5 + $0x88] sm:$0xff]  ;;  %v2319_v55 = vld [vmem:[#allocation5 + $0x90] sm:$0xff] }
  0x49   :  { %326 = vmatpush.msrb.mxu1 %v144_v56  ;;  %349 = vmatpush.msrb.mxu2 %v81_v57  ;;  %3176 = vst [vmem:[#allocation14_spill] sm:$0xff] %v2303_v50  ;;  %v2321_v56 = vld [vmem:[#allocation5 + $0x98] sm:$0xff]  ;;  %v2329_v57 = vld [vmem:[#allocation5 + $0x60] sm:$0xff]  ;;  %v2371_v3 = vld [vmem:[#allocation5 + $0x30] sm:$0xff] }
  0x4a   :  { %372 = vmatpush.msrb.mxu3 %v145_v58  ;;  %304 = vmatpush.msrb.mxu0 %v76_v59  ;;  %3177 = vst [vmem:[#allocation15_spill] sm:$0xff] %v2307_v51  ;;  %v2331_v58 = vld [vmem:[#allocation5 + $0x68] sm:$0xff]  ;;  %v2341_v59 = vld [vmem:[#allocation5 + $0x70] sm:$0xff] }
  0x4b   :  { %327 = vmatpush.msrb.mxu1 %v140_v60  ;;  %350 = vmatpush.msrb.mxu2 %v77_v61  ;;  %3178 = vst [vmem:[#allocation16_spill] sm:$0xff] %v2309_v52  ;;  %v2343_v60 = vld [vmem:[#allocation5 + $0x78] sm:$0xff]  ;;  %v2353_v61 = vld [vmem:[#allocation5 + $0x40] sm:$0xff] }
  0x4c   :  { %373 = vmatpush.msrb.mxu3 %v141_v62  ;;  %305 = vmatpush.msrb.mxu0 %v72_v63  ;;  %3179 = vst [vmem:[#allocation17_spill] sm:$0xff] %v2313_v53  ;;  %v2355_v62 = vld [vmem:[#allocation5 + $0x48] sm:$0xff]  ;;  %v2359_v63 = vld [vmem:[#allocation5 + $0x50] sm:$0xff] }
  0x4d   :  { %328 = vmatpush.msrb.mxu1 %v136_v0  ;;  %351 = vmatpush.msrb.mxu2 %v73_v1  ;;  %3180 = vst [vmem:[#allocation18_spill] sm:$0xff] %v2315_v54  ;;  %v2361_v0 = vld [vmem:[#allocation5 + $0x58] sm:$0xff]  ;;  %v2365_v1 = vld [vmem:[#allocation5 + $0x20] sm:$0xff] }
  0x4e   :  { %374 = vmatpush.msrb.mxu3 %v137_v2  ;;  %3181 = vst [vmem:[#allocation19_spill] sm:$0xff] %v2319_v55  ;;  %v2367_v2 = vld [vmem:[#allocation5 + $0x28] sm:$0xff] }
  0x4f   :  { %3182 = vst [vmem:[#allocation20_spill] sm:$0xff] %v2321_v56 }
  0x50   :  { %3183 = vst [vmem:[#allocation21_spill] sm:$0xff] %v2329_v57 }
  0x51   :  { %3184 = vst [vmem:[#allocation22_spill] sm:$0xff] %v2331_v58 }
  0x52   :  { %3185 = vst [vmem:[#allocation23_spill] sm:$0xff] %v2341_v59 }
  0x53   :  { %3186 = vst [vmem:[#allocation24_spill] sm:$0xff] %v2343_v60 }
  0x54   :  { %3187 = vst [vmem:[#allocation25_spill] sm:$0xff] %v2353_v61 }
  0x55   :  { %3188 = vst [vmem:[#allocation26_spill] sm:$0xff] %v2355_v62 }
  0x56   :  { %3189 = vst [vmem:[#allocation27_spill] sm:$0xff] %v2359_v63 }
  0x57   :  { %3190 = vst [vmem:[#allocation28_spill] sm:$0xff] %v2361_v0 }
  0x58   :  { %3191 = vst [vmem:[#allocation29_spill] sm:$0xff] %v2365_v1 }
  0x59   :  { %3192 = vst [vmem:[#allocation30_spill] sm:$0xff] %v2367_v2 }
  0x5a   :  { %3193 = vst [vmem:[#allocation31_spill] sm:$0xff] %v2371_v3 }
  0x80   :  { %v2125_v6 = vpop.permute.xlu0 %53 }
  0x81   :  { %vm58_vm0 = vcmp.eq.s32.totalorder %v2120_v4, %v2125_v6  ;;  %vm59_vm1 = vcmp.eq.s32.totalorder %v2123_v5, %v2125_v6  ;;  %v2379_v6 = vld [vmem:[#allocation5 + $0x8] sm:$0xff] }
  0x82   :  { %1757 = vmatmul.msk.f32.vlgmr.msra.gmra.mxu0 %vm58_vm0, %v2082_v9  ;;  %1759 = vmatmul.msk.f32.vlgmr.msra.gmra.mxu1 %vm59_vm1, %v2082_v9  ;;  %3196 = vst [vmem:[#allocation34_spill] sm:$0xff] %v2379_v6 }
  0x83   :  { %1761 = vmatmul.msk.f32.vlgmr.msra.gmra.mxu2 %vm58_vm0, %v2082_v9  ;;  %1763 = vmatmul.msk.f32.vlgmr.msra.gmra.mxu3 %vm59_vm1, %v2082_v9 }
  0x84   :  { %446 = vmatpush.msra.mxu0 %v2131_v7  ;;  %466 = vmatpush.msra.mxu1 %v2133_v8 }
  0x85   :  { %486 = vmatpush.msra.mxu2 %v2143_v10  ;;  %506 = vmatpush.msra.mxu3 %v2145_v11 }
  0x86   :  { %447 = vmatpush.msra.mxu0 %v2155_v12  ;;  %467 = vmatpush.msra.mxu1 %v2157_v13 }
  0x87   :  { %487 = vmatpush.msra.mxu2 %v2161_v14  ;;  %507 = vmatpush.msra.mxu3 %v2163_v15 }
  0x88   :  { %448 = vmatpush.msra.mxu0 %v2167_v16  ;;  %468 = vmatpush.msra.mxu1 %v2169_v17  ;;  %v2185_v22 = vpop.permute.xlu0 %56 }
  0x89   :  { %488 = vmatpush.msra.mxu2 %v2173_v18  ;;  %508 = vmatpush.msra.mxu3 %v2175_v19  ;;  %vm60_vm2 = vcmp.eq.s32.totalorder %v2120_v4, %v2185_v22  ;;  %vm61_vm3 = vcmp.eq.s32.totalorder %v2123_v5, %v2185_v22  ;;  %v2373_v4 = vld [vmem:[#allocation5 + $0x38] sm:$0xff]  ;;  %v2377_v5 = vld [vmem:[#allocation5] sm:$0xff] }
  0x8a   :  { %449 = vmatpush.msra.mxu0 %v2179_v20  ;;  %469 = vmatpush.msra.mxu1 %v2181_v21  ;;  %3194 = vst [vmem:[#allocation32_spill] sm:$0xff] %v2373_v4  ;;  %v2385_v22 = vld [vmem:[#allocation5 + $0x18] sm:$0xff] }
  0x8b   :  { %489 = vmatpush.msra.mxu2 %v2187_v23  ;;  %509 = vmatpush.msra.mxu3 %v2189_v24  ;;  %3195 = vst [vmem:[#allocation33_spill] sm:$0xff] %v2377_v5 }
  0x8c   :  { %1758 = vmatmul.msk.f32.gmra.mxu0 %vm60_vm2, %v2082_v9  ;;  %1760 = vmatmul.msk.f32.gmra.mxu1 %vm61_vm3, %v2082_v9  ;;  %3198 = vst [vmem:[#allocation36_spill] sm:$0xff] %v2385_v22 }
  0x8d   :  { %1762 = vmatmul.msk.f32.gmra.mxu2 %vm60_vm2, %v2082_v9  ;;  %1764 = vmatmul.msk.f32.gmra.mxu3 %vm61_vm3, %v2082_v9 }
  0x8e   :  { %450 = vmatpush.msra.mxu0 %v2201_v25  ;;  %470 = vmatpush.msra.mxu1 %v2203_v26 }
  0x8f   :  { %490 = vmatpush.msra.mxu2 %v2213_v27  ;;  %510 = vmatpush.msra.mxu3 %v2215_v28 }
  0x90   :  { %451 = vmatpush.msra.mxu0 %v2225_v29  ;;  %471 = vmatpush.msra.mxu1 %v2227_v30 }
  0x91   :  { %491 = vmatpush.msra.mxu2 %v2231_v31  ;;  %511 = vmatpush.msra.mxu3 %v2233_v32 }
  0x92   :  { %452 = vmatpush.msra.mxu0 %v2237_v33  ;;  %472 = vmatpush.msra.mxu1 %v2239_v34 }
  0x93   :  { %492 = vmatpush.msra.mxu2 %v2243_v35  ;;  %512 = vmatpush.msra.mxu3 %v2245_v36 }
  0x94   :  { %453 = vmatpush.msra.mxu0 %v2249_v37  ;;  %473 = vmatpush.msra.mxu1 %v2251_v38 }
  0x95   :  { %493 = vmatpush.msra.mxu2 %v2255_v39  ;;  %513 = vmatpush.msra.mxu3 %v2257_v40 }
  0x96   :  { %1765 = vmatmul.msk.f32.vlgmr.msrb.gmra.mxu0 %vm58_vm0, %v2082_v9  ;;  %1767 = vmatmul.msk.f32.vlgmr.msrb.gmra.mxu1 %vm59_vm1, %v2082_v9 }
  0x97   :  { %1769 = vmatmul.msk.f32.vlgmr.msrb.gmra.mxu2 %vm58_vm0, %v2082_v9  ;;  %1771 = vmatmul.msk.f32.vlgmr.msrb.gmra.mxu3 %vm59_vm1, %v2082_v9 }
  0x98   :  { %454 = vmatpush.msra.mxu0 %v2265_v41  ;;  %474 = vmatpush.msra.mxu1 %v2267_v42 }
  0x99   :  { %494 = vmatpush.msra.mxu2 %v2277_v43  ;;  %514 = vmatpush.msra.mxu3 %v2279_v44 }
  0x9a   :  { %455 = vmatpush.msra.mxu0 %v2289_v45  ;;  %475 = vmatpush.msra.mxu1 %v2291_v46 }
  0x9b   :  { %495 = vmatpush.msra.mxu2 %v2295_v47  ;;  %515 = vmatpush.msra.mxu3 %v2297_v48 }
  0x9c   :  { %456 = vmatpush.msra.mxu0 %v2301_v49  ;;  %476 = vmatpush.msra.mxu1 %v2303_v50 }
  0x9d   :  { %496 = vmatpush.msra.mxu2 %v2307_v51  ;;  %516 = vmatpush.msra.mxu3 %v2309_v52 }
  0x9e   :  { %457 = vmatpush.msra.mxu0 %v2313_v53  ;;  %477 = vmatpush.msra.mxu1 %v2315_v54 }
  0x9f   :  { %497 = vmatpush.msra.mxu2 %v2319_v55  ;;  %517 = vmatpush.msra.mxu3 %v2321_v56 }
  0xa0   :  { %1766 = vmatmul.msk.f32.gmra.mxu0 %vm60_vm2, %v2082_v9  ;;  %1768 = vmatmul.msk.f32.gmra.mxu1 %vm61_vm3, %v2082_v9 }
  0xa1   :  { %1770 = vmatmul.msk.f32.gmra.mxu2 %vm60_vm2, %v2082_v9  ;;  %1772 = vmatmul.msk.f32.gmra.mxu3 %vm61_vm3, %v2082_v9  ;;  %v2383_v9 = vld [vmem:[#allocation5 + $0x10] sm:$0xff] }
  0xa2   :  { %458 = vmatpush.msra.mxu0 %v2329_v57  ;;  %478 = vmatpush.msra.mxu1 %v2331_v58  ;;  %3197 = vst [vmem:[#allocation35_spill] sm:$0xff] %v2383_v9 }
  0xa3   :  { %498 = vmatpush.msra.mxu2 %v2341_v59  ;;  %518 = vmatpush.msra.mxu3 %v2343_v60 }
  0xa4   :  { %459 = vmatpush.msra.mxu0 %v2353_v61  ;;  %479 = vmatpush.msra.mxu1 %v2355_v62 }
  0xa5   :  { %499 = vmatpush.msra.mxu2 %v2359_v63  ;;  %519 = vmatpush.msra.mxu3 %v2361_v0  ;;  %v2083_v0 = vmov 0.0  }
  0xa6   :  { %460 = vmatpush.msra.mxu0 %v2365_v1  ;;  %480 = vmatpush.msra.mxu1 %v2367_v2 }
  0xa7   :  { %500 = vmatpush.msra.mxu2 %v2371_v3  ;;  %520 = vmatpush.msra.mxu3 %v2373_v4 }
  0xa8   :  { %461 = vmatpush.msra.mxu0 %v2377_v5  ;;  %481 = vmatpush.msra.mxu1 %v2379_v6 }
  0xa9   :  { %501 = vmatpush.msra.mxu2 %v2383_v9  ;;  %521 = vmatpush.msra.mxu3 %v2385_v22 }
  0xaa   :  { %462 = vmatmul.f32.vlgmr.msra.gmra.mxu0 %v2083_v0  ;;  %482 = vmatmul.f32.vlgmr.msra.gmra.mxu1 %v2083_v0 }
  0xab   :  { %502 = vmatmul.f32.vlgmr.msra.gmra.mxu2 %v2083_v0  ;;  %522 = vmatmul.f32.vlgmr.msra.gmra.mxu3 %v2083_v0  ;;  %v3199_v0 = vld [vmem:[#allocation28_spill] sm:$0xff] }
  0xac   :  { %593 = vmatpush.msrb.mxu0 %v2131_v7  ;;  %613 = vmatpush.msrb.mxu1 %v2133_v8 }
  0xad   :  { %633 = vmatpush.msrb.mxu2 %v2143_v10  ;;  %653 = vmatpush.msrb.mxu3 %v2145_v11 }
  0xae   :  { %594 = vmatpush.msrb.mxu0 %v2155_v12  ;;  %614 = vmatpush.msrb.mxu1 %v2157_v13 }
  0xaf   :  { %634 = vmatpush.msrb.mxu2 %v2161_v14  ;;  %654 = vmatpush.msrb.mxu3 %v2163_v15 }
  0xb0   :  { %595 = vmatpush.msrb.mxu0 %v2167_v16  ;;  %615 = vmatpush.msrb.mxu1 %v2169_v17 }
  0xb1   :  { %635 = vmatpush.msrb.mxu2 %v2173_v18  ;;  %655 = vmatpush.msrb.mxu3 %v2175_v19 }
  0xb2   :  { %596 = vmatpush.msrb.mxu0 %v2179_v20  ;;  %616 = vmatpush.msrb.mxu1 %v2181_v21 }
  0xb3   :  { %636 = vmatpush.msrb.mxu2 %v2187_v23  ;;  %656 = vmatpush.msrb.mxu3 %v2189_v24 }
  0xb4   :  { %597 = vmatpush.msrb.mxu0 %v2201_v25  ;;  %617 = vmatpush.msrb.mxu1 %v2203_v26 }
  0xb5   :  { %637 = vmatpush.msrb.mxu2 %v2213_v27  ;;  %657 = vmatpush.msrb.mxu3 %v2215_v28 }
  0xb6   :  { %598 = vmatpush.msrb.mxu0 %v2225_v29  ;;  %618 = vmatpush.msrb.mxu1 %v2227_v30 }
  0xb7   :  { %638 = vmatpush.msrb.mxu2 %v2231_v31  ;;  %658 = vmatpush.msrb.mxu3 %v2233_v32 }
  0xb8   :  { %599 = vmatpush.msrb.mxu0 %v2237_v33  ;;  %619 = vmatpush.msrb.mxu1 %v2239_v34 }
  0xb9   :  { %639 = vmatpush.msrb.mxu2 %v2243_v35  ;;  %659 = vmatpush.msrb.mxu3 %v2245_v36 }
  0xba   :  { %600 = vmatpush.msrb.mxu0 %v2249_v37  ;;  %620 = vmatpush.msrb.mxu1 %v2251_v38 }
  0xbb   :  { %640 = vmatpush.msrb.mxu2 %v2255_v39  ;;  %660 = vmatpush.msrb.mxu3 %v2257_v40 }
  0xbc   :  { %601 = vmatpush.msrb.mxu0 %v2265_v41  ;;  %621 = vmatpush.msrb.mxu1 %v2267_v42 }
  0xbd   :  { %641 = vmatpush.msrb.mxu2 %v2277_v43  ;;  %661 = vmatpush.msrb.mxu3 %v2279_v44 }
  0xbe   :  { %602 = vmatpush.msrb.mxu0 %v2289_v45  ;;  %622 = vmatpush.msrb.mxu1 %v2291_v46 }
  0xbf   :  { %642 = vmatpush.msrb.mxu2 %v2295_v47  ;;  %662 = vmatpush.msrb.mxu3 %v2297_v48 }
  0xc0   :  { %603 = vmatpush.msrb.mxu0 %v2301_v49  ;;  %623 = vmatpush.msrb.mxu1 %v2303_v50 }
  0xc1   :  { %643 = vmatpush.msrb.mxu2 %v2307_v51  ;;  %663 = vmatpush.msrb.mxu3 %v2309_v52 }
  0xc2   :  { %604 = vmatpush.msrb.mxu0 %v2313_v53  ;;  %624 = vmatpush.msrb.mxu1 %v2315_v54 }
  0xc3   :  { %644 = vmatpush.msrb.mxu2 %v2319_v55  ;;  %664 = vmatpush.msrb.mxu3 %v2321_v56 }
  0xc4   :  { %605 = vmatpush.msrb.mxu0 %v2329_v57  ;;  %625 = vmatpush.msrb.mxu1 %v2331_v58 }
  0xc5   :  { %645 = vmatpush.msrb.mxu2 %v2341_v59  ;;  %665 = vmatpush.msrb.mxu3 %v2343_v60 }
  0xc6   :  { %606 = vmatpush.msrb.mxu0 %v2353_v61  ;;  %626 = vmatpush.msrb.mxu1 %v2355_v62 }
  0xc7   :  { %646 = vmatpush.msrb.mxu2 %v2359_v63  ;;  %666 = vmatpush.msrb.mxu3 %v3199_v0 }
  0xc8   :  { %607 = vmatpush.msrb.mxu0 %v2365_v1  ;;  %627 = vmatpush.msrb.mxu1 %v2367_v2 }
  0xc9   :  { %647 = vmatpush.msrb.mxu2 %v2371_v3  ;;  %667 = vmatpush.msrb.mxu3 %v2373_v4 }
  0xca   :  { %608 = vmatpush.msrb.mxu0 %v2377_v5  ;;  %628 = vmatpush.msrb.mxu1 %v2379_v6 }
  0xcb   :  { %648 = vmatpush.msrb.mxu2 %v2383_v9  ;;  %668 = vmatpush.msrb.mxu3 %v2385_v22 }
  0xcc   :  { %758 = vmatpush.msra.mxu0 %v2131_v7  ;;  %778 = vmatpush.msra.mxu1 %v2133_v8 }
  0xcd   :  { %798 = vmatpush.msra.mxu2 %v2143_v10  ;;  %818 = vmatpush.msra.mxu3 %v2145_v11 }
  0xce   :  { %759 = vmatpush.msra.mxu0 %v2155_v12  ;;  %779 = vmatpush.msra.mxu1 %v2157_v13 }
  0xcf   :  { %799 = vmatpush.msra.mxu2 %v2161_v14  ;;  %819 = vmatpush.msra.mxu3 %v2163_v15 }
  0xd0   :  { %760 = vmatpush.msra.mxu0 %v2167_v16  ;;  %780 = vmatpush.msra.mxu1 %v2169_v17 }
  0xd1   :  { %800 = vmatpush.msra.mxu2 %v2173_v18  ;;  %820 = vmatpush.msra.mxu3 %v2175_v19 }
  0xd2   :  { %761 = vmatpush.msra.mxu0 %v2179_v20  ;;  %781 = vmatpush.msra.mxu1 %v2181_v21 }
  0xd3   :  { %801 = vmatpush.msra.mxu2 %v2187_v23  ;;  %821 = vmatpush.msra.mxu3 %v2189_v24 }
  0xd4   :  { %762 = vmatpush.msra.mxu0 %v2201_v25  ;;  %782 = vmatpush.msra.mxu1 %v2203_v26 }
  0xd5   :  { %802 = vmatpush.msra.mxu2 %v2213_v27  ;;  %822 = vmatpush.msra.mxu3 %v2215_v28 }
  0xd6   :  { %763 = vmatpush.msra.mxu0 %v2225_v29  ;;  %783 = vmatpush.msra.mxu1 %v2227_v30 }
  0xd7   :  { %803 = vmatpush.msra.mxu2 %v2231_v31  ;;  %823 = vmatpush.msra.mxu3 %v2233_v32 }
  0xd8   :  { %764 = vmatpush.msra.mxu0 %v2237_v33  ;;  %784 = vmatpush.msra.mxu1 %v2239_v34 }
  0xd9   :  { %804 = vmatpush.msra.mxu2 %v2243_v35  ;;  %824 = vmatpush.msra.mxu3 %v2245_v36 }
  0xda   :  { %765 = vmatpush.msra.mxu0 %v2249_v37  ;;  %785 = vmatpush.msra.mxu1 %v2251_v38 }
  0xdb   :  { %805 = vmatpush.msra.mxu2 %v2255_v39  ;;  %825 = vmatpush.msra.mxu3 %v2257_v40 }
  0xdc   :  { %766 = vmatpush.msra.mxu0 %v2265_v41  ;;  %786 = vmatpush.msra.mxu1 %v2267_v42 }
  0xdd   :  { %806 = vmatpush.msra.mxu2 %v2277_v43  ;;  %826 = vmatpush.msra.mxu3 %v2279_v44 }
  0xde   :  { %767 = vmatpush.msra.mxu0 %v2289_v45  ;;  %787 = vmatpush.msra.mxu1 %v2291_v46 }
  0xdf   :  { %807 = vmatpush.msra.mxu2 %v2295_v47  ;;  %827 = vmatpush.msra.mxu3 %v2297_v48 }
  0xe0   :  { %768 = vmatpush.msra.mxu0 %v2301_v49  ;;  %788 = vmatpush.msra.mxu1 %v2303_v50 }
  0xe1   :  { %808 = vmatpush.msra.mxu2 %v2307_v51  ;;  %828 = vmatpush.msra.mxu3 %v2309_v52 }
  0xe2   :  { %769 = vmatpush.msra.mxu0 %v2313_v53  ;;  %789 = vmatpush.msra.mxu1 %v2315_v54 }
  0xe3   :  { %809 = vmatpush.msra.mxu2 %v2319_v55  ;;  %829 = vmatpush.msra.mxu3 %v2321_v56 }
  0xe4   :  { %770 = vmatpush.msra.mxu0 %v2329_v57  ;;  %790 = vmatpush.msra.mxu1 %v2331_v58 }
  0xe5   :  { %810 = vmatpush.msra.mxu2 %v2341_v59  ;;  %830 = vmatpush.msra.mxu3 %v2343_v60 }
  0xe6   :  { %771 = vmatpush.msra.mxu0 %v2353_v61  ;;  %791 = vmatpush.msra.mxu1 %v2355_v62 }
  0xe7   :  { %811 = vmatpush.msra.mxu2 %v2359_v63  ;;  %831 = vmatpush.msra.mxu3 %v3199_v0 }
  0xe8   :  { %772 = vmatpush.msra.mxu0 %v2365_v1  ;;  %792 = vmatpush.msra.mxu1 %v2367_v2 }
  0xe9   :  { %812 = vmatpush.msra.mxu2 %v2371_v3  ;;  %832 = vmatpush.msra.mxu3 %v2373_v4 }
  0xea   :  { %773 = vmatpush.msra.mxu0 %v2377_v5  ;;  %793 = vmatpush.msra.mxu1 %v2379_v6 }
  0xeb   :  { %813 = vmatpush.msra.mxu2 %v2383_v9  ;;  %833 = vmatpush.msra.mxu3 %v2385_v22 }
  0xff   :  { %v215_v62 = vpop.f32.mrf.mxu0  ;;  %v238_v63 = vpop.f32.mrf.mxu1 }
 0x100   :  { %v2529_v52 = vadd.f32 %v238_v63, %v215_v62 }
 0x102   :  { %3204 = vst [vmem:[#allocation41_spill] sm:$0xff] %v2529_v52 }
 0x106   :  { %v261_v61 = vpop.f32.mrf.mxu2  ;;  %v284_v0 = vpop.f32.mrf.mxu3 }
 0x109   :  { %v218_v60 = vpop.f32.mrf.mxu0  ;;  %v241_v1 = vpop.f32.mrf.mxu1 }
 0x10a   :  { %v2521_v59 = vadd.f32 %v241_v1, %v218_v60  ;;  %v2531_v60 = vadd.f32 %v284_v0, %v261_v61 }
 0x10c   :  { %3200 = vst [vmem:[#allocation37_spill] sm:$0xff] %v2521_v59 }
 0x10d   :  { %3205 = vst [vmem:[#allocation42_spill] sm:$0xff] %v2531_v60 }
 0x110   :  { %v264_v2 = vpop.f32.mrf.mxu2  ;;  %v287_v3 = vpop.f32.mrf.mxu3 }
 0x111   :  { %v2523_v58 = vadd.f32 %v287_v3, %v264_v2 }
 0x113   :  { %3201 = vst [vmem:[#allocation38_spill] sm:$0xff] %v2523_v58  ;;  %v307_v4 = vpop.f32.mrf.mxu0  ;;  %v330_v5 = vpop.f32.mrf.mxu1 }
 0x114   :  { %v2535_v50 = vadd.f32 %v330_v5, %v307_v4 }
 0x116   :  { %3206 = vst [vmem:[#allocation43_spill] sm:$0xff] %v2535_v50 }
 0x11a   :  { %v353_v57 = vpop.f32.mrf.mxu2  ;;  %v376_v6 = vpop.f32.mrf.mxu3 }
 0x11d   :  { %v310_v56 = vpop.f32.mrf.mxu0  ;;  %v333_v9 = vpop.f32.mrf.mxu1 }
 0x11e   :  { %v2525_v55 = vadd.f32 %v333_v9, %v310_v56 }
 0x120   :  { %3202 = vst [vmem:[#allocation39_spill] sm:$0xff] %v2525_v55 }
 0x124   :  { %v356_v22 = vpop.f32.mrf.mxu2  ;;  %v379_v54 = vpop.f32.mrf.mxu3 }
 0x125   :  { %v2527_v53 = vadd.f32 %v379_v54, %v356_v22 }
 0x127   :  { %3203 = vst [vmem:[#allocation40_spill] sm:$0xff] %v2527_v53  ;;  %v463_v1 = vpop.f32.mrf.mxu0  ;;  %v483_v59 = vpop.f32.mrf.mxu1 }
 0x128   :  { %v526_v2 = vadd.f32 %v463_v1, %v2529_v52  ;;  %v527_v3 = vadd.f32 %v483_v59, %v2531_v60  ;;  %v2538_v59 = vadd.f32 %v376_v6, %v353_v57 }
 0x12a   :  { %v1773_v58 = vmul.f32 -1.442695, %v526_v2  ;;  %v1774_v51 = vmul.f32 -1.442695, %v527_v3  ;;  %3207 = vst [vmem:[#allocation44_spill] sm:$0xff] %v2538_v59 }
 0x12c   :  { %1807 = vpow2.f32 %v1773_v58 }
 0x12d   :  { %1809 = vpow2.f32 %v1774_v51 }
 0x12e   :  { %v503_v56 = vpop.f32.mrf.mxu2  ;;  %v523_v0 = vpop.f32.mrf.mxu3 }
 0x12f   :  { %v528_v54 = vadd.f32 %v503_v56, %v2535_v50  ;;  %v529_v4 = vadd.f32 %v523_v0, %v2538_v59 }
 0x131   :  { %v1775_v9 = vmul.f32 -1.442695, %v528_v54 }
 0x132   :  { %v1808_v62 = vpop.eup %1807 }
 0x133   :  { %v1810_v63 = vpop.eup %1809  ;;  %v539_v61 = vadd.f32 1.0, %v1808_v62  ;;  %1811 = vpow2.f32 %v1775_v9 }
 0x134   :  { %v540_v22 = vadd.f32 1.0, %v1810_v63 }
 0x135   :  { %1813 = vrcp.f32 %v539_v61  ;;  %v553_v53 = vand.u32 2147483648, %v539_v61  ;;  %v551_v63 = vand.u32 2147483647, %v539_v61  ;;  %vm547_vm6 = vweird.f32 %v539_v61 }
 0x136   :  { %1815 = vrcp.f32 %v540_v22  ;;  %v568_v9 = vand.u32 2147483648, %v540_v22  ;;  %v566_v57 = vand.u32 2147483647, %v540_v22  ;;  %vm562_vm7 = vweird.f32 %v540_v22 }
 0x137   :  { %v554_v59 = vor.u32 1.1754944e-38, %v553_v53  ;;  %vm552_vm9 = vcmp.eq.f32.partialorder %v551_v63, 8.507059e+37  ;;  %v3231_v63 = vld [vmem:[#allocation34_spill] sm:$0xff] }
 0x138   :  { %v569_v60 = vor.u32 1.1754944e-38, %v568_v9  ;;  %vm567_vm11 = vcmp.eq.f32.partialorder %v566_v57, 8.507059e+37  ;;  %v3230_v9 = vld [vmem:[#allocation33_spill] sm:$0xff]  ;;  %v3232_v57 = vld [vmem:[#allocation35_spill] sm:$0xff] }
 0x139   :  { %v1812_v1 = vpop.eup %1811 }
 0x13a   :  { %v541_v2 = vadd.f32 1.0, %v1812_v1 }
 0x13b   :  { %v1814_v58 = vpop.eup %1813 }
 0x13c   :  { %v1816_v51 = vpop.eup %1815  ;;  %v543_v5 = vmul.f32 %v1814_v58, %v539_v61  ;;  %1817 = vrcp.f32 %v541_v2  ;;  %vm548_vm4 = vweird.f32 %v1814_v58  ;;  %v583_v53 = vand.u32 2147483648, %v541_v2 }
 0x13d   :  { %v558_v3 = vmul.f32 %v1816_v51, %v540_v22  ;;  %1819 = vtanh.f32 %v529_v4  ;;  %vm563_vm5 = vweird.f32 %v1816_v51  ;;  %vm549_vm8 = vmor %vm547_vm6, %vm548_vm4  ;;  %vm577_vm13 = vweird.f32 %v541_v2 }
 0x13e   :  { %v544_v56 = vsub.f32 1.0, %v543_v5  ;;  %vm564_vm10 = vmor %vm562_vm7, %vm563_vm5 }
 0x13f   :  { %v559_v54 = vsub.f32 1.0, %v558_v3 }
 0x140   :  { %v545_v62 = vmul.f32 %v1814_v58, %v544_v56 }
 0x141   :  { %v560_v55 = vmul.f32 %v1816_v51, %v559_v54 }
 0x142   :  { %v1818_v6 = vpop.eup %1817  ;;  %v546_v1 = vadd.f32 %v1814_v58, %v545_v62 }
 0x143   :  { %v573_v0 = vmul.f32 %v1818_v6, %v541_v2  ;;  %v561_v50 = vadd.f32 %v1816_v51, %v560_v55  ;;  %v1820_v4 = vpop.eup %1819  ;;  %vm578_vm12 = vweird.f32 %v1818_v6  ;;  %v581_v55 = vand.u32 2147483647, %v541_v2  ;;  %v3229_v2 = vld [vmem:[#allocation32_spill] sm:$0xff] }
 0x144   :  { %v550_v5 = vsel %vm549_vm8, %v1814_v58, %v546_v1  ;;  %vm579_vm14 = vmor %vm577_vm13, %vm578_vm12  ;;  %v584_v58 = vor.u32 1.1754944e-38, %v583_v53 }
 0x145   :  { %v574_v3 = vsub.f32 1.0, %v573_v0  ;;  %v555_v56 = vsel %vm552_vm9, %v554_v59, %v550_v5  ;;  %v565_v52 = vsel %vm564_vm10, %v1816_v51, %v561_v50  ;;  %vm582_vm15 = vcmp.eq.f32.partialorder %v581_v55, 8.507059e+37 }
 0x146   :  { %v570_v54 = vsel %vm567_vm11, %v569_v60, %v565_v52  ;;  %v589_v49 = vmul.f32 %v1820_v4, %v555_v56  ;;  %v3227_v52 = vld [vmem:[#allocation30_spill] sm:$0xff]  ;;  %v3228_v60 = vld [vmem:[#allocation31_spill] sm:$0xff] }
 0x147   :  { %v588_v48 = vmul.f32 0.0, %v570_v54  ;;  %v575_v47 = vmul.f32 %v1818_v6, %v574_v3  ;;  %v3234_v3 = vld [vmem:[#allocation41_spill] sm:$0xff]  ;;  %v3235_v54 = vld [vmem:[#allocation42_spill] sm:$0xff] }
 0x149   :  { %v2541_v62 = vadd.f32 %v589_v49, %v588_v48  ;;  %v576_v61 = vadd.f32 %v1818_v6, %v575_v47  ;;  %v3224_v47 = vld [vmem:[#allocation27_spill] sm:$0xff]  ;;  %v3225_v48 = vld [vmem:[#allocation28_spill] sm:$0xff]  ;;  %v3226_v49 = vld [vmem:[#allocation29_spill] sm:$0xff] }
 0x14b   :  { %1821 = vtanh.f32 %v2541_v62  ;;  %v580_v22 = vsel %vm579_vm14, %v1818_v6, %v576_v61  ;;  %v3233_v6 = vld [vmem:[#allocation36_spill] sm:$0xff] }
 0x14c   :  { %v585_v50 = vsel %vm582_vm15, %v584_v58, %v580_v22 }
 0x151   :  { %v1822_v59 = vpop.eup %1821 }
 0x152   :  { %v592_v51 = vmul.f32 %v1822_v59, %v585_v50  ;;  %v3236_v59 = vld [vmem:[#allocation43_spill] sm:$0xff] }
 0x154   :  { %609 = vmatmul.f32.vlgmr.msrb.gmra.mxu0 %v592_v51  ;;  %629 = vmatmul.f32.vlgmr.msrb.gmra.mxu1 %v592_v51 }
 0x155   :  { %649 = vmatmul.f32.vlgmr.msrb.gmra.mxu2 %v592_v51  ;;  %669 = vmatmul.f32.vlgmr.msrb.gmra.mxu3 %v592_v51 }
 0x156   :  { %923 = vmatpush.msrb.mxu0 %v2131_v7  ;;  %943 = vmatpush.msrb.mxu1 %v2133_v8  ;;  %v3208_v7 = vld [vmem:[#allocation11_spill] sm:$0xff]  ;;  %v3209_v8 = vld [vmem:[#allocation12_spill] sm:$0xff] }
 0x157   :  { %963 = vmatpush.msrb.mxu2 %v2143_v10  ;;  %983 = vmatpush.msrb.mxu3 %v2145_v11  ;;  %v3210_v10 = vld [vmem:[#allocation13_spill] sm:$0xff]  ;;  %v3211_v11 = vld [vmem:[#allocation14_spill] sm:$0xff] }
 0x158   :  { %924 = vmatpush.msrb.mxu0 %v2155_v12  ;;  %944 = vmatpush.msrb.mxu1 %v2157_v13  ;;  %v3212_v12 = vld [vmem:[#allocation15_spill] sm:$0xff]  ;;  %v3213_v13 = vld [vmem:[#allocation16_spill] sm:$0xff] }
 0x159   :  { %964 = vmatpush.msrb.mxu2 %v2161_v14  ;;  %984 = vmatpush.msrb.mxu3 %v2163_v15  ;;  %v3214_v14 = vld [vmem:[#allocation17_spill] sm:$0xff]  ;;  %v3215_v15 = vld [vmem:[#allocation18_spill] sm:$0xff] }
 0x15a   :  { %925 = vmatpush.msrb.mxu0 %v2167_v16  ;;  %945 = vmatpush.msrb.mxu1 %v2169_v17  ;;  %v3216_v16 = vld [vmem:[#allocation19_spill] sm:$0xff]  ;;  %v3217_v17 = vld [vmem:[#allocation20_spill] sm:$0xff] }
 0x15b   :  { %965 = vmatpush.msrb.mxu2 %v2173_v18  ;;  %985 = vmatpush.msrb.mxu3 %v2175_v19  ;;  %v3218_v18 = vld [vmem:[#allocation21_spill] sm:$0xff]  ;;  %v3219_v19 = vld [vmem:[#allocation22_spill] sm:$0xff] }
 0x15c   :  { %926 = vmatpush.msrb.mxu0 %v2179_v20  ;;  %946 = vmatpush.msrb.mxu1 %v2181_v21  ;;  %v3220_v20 = vld [vmem:[#allocation23_spill] sm:$0xff]  ;;  %v3221_v21 = vld [vmem:[#allocation24_spill] sm:$0xff] }
 0x15d   :  { %966 = vmatpush.msrb.mxu2 %v2187_v23  ;;  %986 = vmatpush.msrb.mxu3 %v2189_v24  ;;  %v3222_v23 = vld [vmem:[#allocation25_spill] sm:$0xff]  ;;  %v3223_v24 = vld [vmem:[#allocation26_spill] sm:$0xff] }
 0x15e   :  { %927 = vmatpush.msrb.mxu0 %v2201_v25  ;;  %947 = vmatpush.msrb.mxu1 %v2203_v26 }
 0x15f   :  { %967 = vmatpush.msrb.mxu2 %v2213_v27  ;;  %987 = vmatpush.msrb.mxu3 %v2215_v28 }
 0x160   :  { %928 = vmatpush.msrb.mxu0 %v2225_v29  ;;  %948 = vmatpush.msrb.mxu1 %v2227_v30 }
 0x161   :  { %968 = vmatpush.msrb.mxu2 %v2231_v31  ;;  %988 = vmatpush.msrb.mxu3 %v2233_v32 }
 0x162   :  { %929 = vmatpush.msrb.mxu0 %v2237_v33  ;;  %949 = vmatpush.msrb.mxu1 %v2239_v34 }
 0x163   :  { %969 = vmatpush.msrb.mxu2 %v2243_v35  ;;  %989 = vmatpush.msrb.mxu3 %v2245_v36 }
 0x164   :  { %930 = vmatpush.msrb.mxu0 %v2249_v37  ;;  %950 = vmatpush.msrb.mxu1 %v2251_v38 }
 0x165   :  { %970 = vmatpush.msrb.mxu2 %v2255_v39  ;;  %990 = vmatpush.msrb.mxu3 %v2257_v40 }
 0x166   :  { %931 = vmatpush.msrb.mxu0 %v2265_v41  ;;  %951 = vmatpush.msrb.mxu1 %v2267_v42 }
 0x167   :  { %971 = vmatpush.msrb.mxu2 %v2277_v43  ;;  %991 = vmatpush.msrb.mxu3 %v2279_v44 }
 0x168   :  { %932 = vmatpush.msrb.mxu0 %v2289_v45  ;;  %952 = vmatpush.msrb.mxu1 %v2291_v46 }
 0x169   :  { %972 = vmatpush.msrb.mxu2 %v3208_v7  ;;  %992 = vmatpush.msrb.mxu3 %v3209_v8 }
 0x16a   :  { %933 = vmatpush.msrb.mxu0 %v3210_v10  ;;  %953 = vmatpush.msrb.mxu1 %v3211_v11 }
 0x16b   :  { %973 = vmatpush.msrb.mxu2 %v3212_v12  ;;  %993 = vmatpush.msrb.mxu3 %v3213_v13 }
 0x16c   :  { %934 = vmatpush.msrb.mxu0 %v3214_v14  ;;  %954 = vmatpush.msrb.mxu1 %v3215_v15 }
 0x16d   :  { %974 = vmatpush.msrb.mxu2 %v3216_v16  ;;  %994 = vmatpush.msrb.mxu3 %v3217_v17 }
 0x16e   :  { %935 = vmatpush.msrb.mxu0 %v3218_v18  ;;  %955 = vmatpush.msrb.mxu1 %v3219_v19 }
 0x16f   :  { %975 = vmatpush.msrb.mxu2 %v3220_v20  ;;  %995 = vmatpush.msrb.mxu3 %v3221_v21 }
 0x170   :  { %936 = vmatpush.msrb.mxu0 %v3222_v23  ;;  %956 = vmatpush.msrb.mxu1 %v3223_v24 }
 0x171   :  { %976 = vmatpush.msrb.mxu2 %v3224_v47  ;;  %996 = vmatpush.msrb.mxu3 %v3225_v48 }
 0x172   :  { %937 = vmatpush.msrb.mxu0 %v3226_v49  ;;  %957 = vmatpush.msrb.mxu1 %v3227_v52 }
 0x173   :  { %977 = vmatpush.msrb.mxu2 %v3228_v60  ;;  %997 = vmatpush.msrb.mxu3 %v3229_v2 }
 0x174   :  { %938 = vmatpush.msrb.mxu0 %v3230_v9  ;;  %958 = vmatpush.msrb.mxu1 %v3231_v63 }
 0x175   :  { %978 = vmatpush.msrb.mxu2 %v3232_v57  ;;  %998 = vmatpush.msrb.mxu3 %v3233_v6 }
 0x1d1   :  { %v610_v1 = vpop.f32.mrf.mxu0  ;;  %v630_v0 = vpop.f32.mrf.mxu1 }
 0x1d2   :  { %v677_v5 = vrot.slane %v610_v1, 6  ;;  %v678_v4 = vrot.slane %v630_v0, 6 }
 0x1d4   :  { %v685_v56 = vadd.f32 %v677_v5, %v3234_v3  ;;  %v686_v61 = vadd.f32 %v678_v4, %v3235_v54 }
 0x1d6   :  { %v1776_v53 = vmul.f32 -1.442695, %v685_v56  ;;  %v1777_v55 = vmul.f32 -1.442695, %v686_v61  ;;  %v3237_v61 = vld [vmem:[#allocation44_spill] sm:$0xff] }
 0x1d8   :  { %1823 = vpow2.f32 %v1776_v53  ;;  %v650_v22 = vpop.f32.mrf.mxu2  ;;  %v670_v1 = vpop.f32.mrf.mxu3 }
 0x1d9   :  { %1825 = vpow2.f32 %v1777_v55  ;;  %v679_v58 = vrot.slane %v650_v22, 6  ;;  %v680_v0 = vrot.slane %v670_v1, 6 }
 0x1db   :  { %v687_v50 = vadd.f32 %v679_v58, %v3236_v59  ;;  %v688_v53 = vadd.f32 %v680_v0, %v3237_v61 }
 0x1dd   :  { %v1778_v51 = vmul.f32 -1.442695, %v687_v50 }
 0x1de   :  { %v1824_v57 = vpop.eup %1823 }
 0x1df   :  { %v1826_v63 = vpop.eup %1825  ;;  %v698_v6 = vadd.f32 1.0, %v1824_v57  ;;  %1827 = vpow2.f32 %v1778_v51 }
 0x1e0   :  { %v699_v9 = vadd.f32 1.0, %v1826_v63 }
 0x1e1   :  { %1829 = vrcp.f32 %v698_v6  ;;  %v712_v59 = vand.u32 2147483648, %v698_v6  ;;  %v710_v63 = vand.u32 2147483647, %v698_v6  ;;  %vm706_vm2 = vweird.f32 %v698_v6 }
 0x1e2   :  { %1831 = vrcp.f32 %v699_v9  ;;  %v727_v57 = vand.u32 2147483648, %v699_v9  ;;  %v725_v1 = vand.u32 2147483647, %v699_v9  ;;  %vm721_vm3 = vweird.f32 %v699_v9 }
 0x1e3   :  { %v713_v61 = vor.u32 1.1754944e-38, %v712_v59  ;;  %vm711_vm6 = vcmp.eq.f32.partialorder %v710_v63, 8.507059e+37  ;;  %v2637_v63 = vld [vmem:[#allocation5 + $0x1d8] sm:$0xff] }
 0x1e4   :  { %vm726_vm7 = vcmp.eq.f32.partialorder %v725_v1, 8.507059e+37  ;;  %v2640_v1 = vld [vmem:[#allocation5 + $0x1a0] sm:$0xff] }
 0x1e5   :  { %v1828_v5 = vpop.eup %1827 }
 0x1e6   :  { %v700_v4 = vadd.f32 1.0, %v1828_v5 }
 0x1e7   :  { %v1830_v56 = vpop.eup %1829 }
 0x1e8   :  { %v1832_v54 = vpop.eup %1831  ;;  %v702_v55 = vmul.f32 %v1830_v56, %v698_v6  ;;  %1833 = vrcp.f32 %v700_v4  ;;  %vm707_vm0 = vweird.f32 %v1830_v56  ;;  %vm736_vm9 = vweird.f32 %v700_v4 }
 0x1e9   :  { %v717_v22 = vmul.f32 %v1832_v54, %v699_v9  ;;  %1835 = vtanh.f32 %v688_v53  ;;  %vm722_vm1 = vweird.f32 %v1832_v54  ;;  %vm708_vm4 = vmor %vm706_vm2, %vm707_vm0 }
 0x1ea   :  { %v703_v58 = vsub.f32 1.0, %v702_v55  ;;  %v748_v55 = vrot.slane %v2541_v62, 6  ;;  %vm723_vm5 = vmor %vm721_vm3, %vm722_vm1  ;;  %v742_v62 = vand.u32 2147483648, %v700_v4 }
 0x1eb   :  { %v718_v50 = vsub.f32 1.0, %v717_v22  ;;  %v728_v22 = vor.u32 1.1754944e-38, %v727_v57 }
 0x1ec   :  { %v704_v51 = vmul.f32 %v1830_v56, %v703_v58 }
 0x1ed   :  { %v719_v3 = vmul.f32 %v1832_v54, %v718_v50 }
 0x1ee   :  { %v1834_v2 = vpop.eup %1833  ;;  %v705_v5 = vadd.f32 %v1830_v56, %v704_v51 }
 0x1ef   :  { %v732_v0 = vmul.f32 %v1834_v2, %v700_v4  ;;  %v720_v60 = vadd.f32 %v1832_v54, %v719_v3  ;;  %v1836_v58 = vpop.eup %1835  ;;  %vm737_vm8 = vweird.f32 %v1834_v2  ;;  %v740_v3 = vand.u32 2147483647, %v700_v4  ;;  %v2634_v4 = vld [vmem:[#allocation5 + $0x1d0] sm:$0xff] }
 0x1f0   :  { %v709_v53 = vsel %vm708_vm4, %v1830_v56, %v705_v5  ;;  %vm738_vm10 = vmor %vm736_vm9, %vm737_vm8  ;;  %v743_v56 = vor.u32 1.1754944e-38, %v742_v62  ;;  %v2643_v5 = vld [vmem:[#allocation5 + $0x1a8] sm:$0xff] }
 0x1f1   :  { %v733_v52 = vsub.f32 1.0, %v732_v0  ;;  %v714_v49 = vsel %vm711_vm6, %v713_v61, %v709_v53  ;;  %v724_v50 = vsel %vm723_vm5, %v1832_v54, %v720_v60  ;;  %vm741_vm11 = vcmp.eq.f32.partialorder %v740_v3, 8.507059e+37  ;;  %v2646_v0 = vld [vmem:[#allocation5 + $0x1b0] sm:$0xff]  ;;  %v2655_v53 = vld [vmem:[#allocation5 + $0x188] sm:$0xff] }
 0x1f2   :  { %v729_v48 = vsel %vm726_vm7, %v728_v22, %v724_v50  ;;  %v751_v47 = vmul.f32 %v1836_v58, %v714_v49  ;;  %v2622_v49 = vld [vmem:[#allocation5 + $0x1f0] sm:$0xff]  ;;  %v2652_v22 = vld [vmem:[#allocation5 + $0x180] sm:$0xff]  ;;  %v2661_v50 = vld [vmem:[#allocation5 + $0x198] sm:$0xff] }
 0x1f3   :  { %v750_v51 = vmul.f32 %v748_v55, %v729_v48  ;;  %v734_v6 = vmul.f32 %v1834_v2, %v733_v52  ;;  %v2619_v48 = vld [vmem:[#allocation5 + $0x1e8] sm:$0xff]  ;;  %v2628_v52 = vld [vmem:[#allocation5 + $0x1c0] sm:$0xff]  ;;  %v2649_v55 = vld [vmem:[#allocation5 + $0x1b8] sm:$0xff] }
 0x1f4   :  { %v2658_v58 = vld [vmem:[#allocation5 + $0x190] sm:$0xff] }
 0x1f5   :  { %v2613_v9 = vadd.f32 %v751_v47, %v750_v51  ;;  %v735_v24 = vadd.f32 %v1834_v2, %v734_v6  ;;  %v2616_v47 = vld [vmem:[#allocation5 + $0x1e0] sm:$0xff] }
 0x1f7   :  { %1837 = vtanh.f32 %v2613_v9  ;;  %v739_v59 = vsel %vm738_vm10, %v1834_v2, %v735_v24  ;;  %v2625_v24 = vld [vmem:[#allocation5 + $0x1f8] sm:$0xff]  ;;  %v2631_v2 = vld [vmem:[#allocation5 + $0x1c8] sm:$0xff] }
 0x1f8   :  { %v744_v60 = vsel %vm741_vm11, %v743_v56, %v739_v59 }
 0x1fd   :  { %v1838_v61 = vpop.eup %1837 }
 0x1fe   :  { %v754_v54 = vmul.f32 %v1838_v61, %v744_v60 }
 0x200   :  { %v756_v57 = vrot.slane %v754_v54, 2 }
 0x202   :  { %774 = vmatmul.f32.vlgmr.msra.gmra.mxu0 %v756_v57  ;;  %794 = vmatmul.f32.vlgmr.msra.gmra.mxu1 %v756_v57 }
 0x203   :  { %814 = vmatmul.f32.vlgmr.msra.gmra.mxu2 %v756_v57  ;;  %834 = vmatmul.f32.vlgmr.msra.gmra.mxu3 %v756_v57 }
 0x204   :  { %1088 = vmatpush.msra.mxu0 %v2616_v47  ;;  %1108 = vmatpush.msra.mxu1 %v2619_v48 }
 0x205   :  { %1128 = vmatpush.msra.mxu2 %v2622_v49  ;;  %1148 = vmatpush.msra.mxu3 %v2625_v24 }
 0x206   :  { %1089 = vmatpush.msra.mxu0 %v2628_v52  ;;  %1109 = vmatpush.msra.mxu1 %v2631_v2 }
 0x207   :  { %1129 = vmatpush.msra.mxu2 %v2634_v4  ;;  %1149 = vmatpush.msra.mxu3 %v2637_v63 }
 0x208   :  { %1090 = vmatpush.msra.mxu0 %v2640_v1  ;;  %1110 = vmatpush.msra.mxu1 %v2643_v5 }
 0x209   :  { %1130 = vmatpush.msra.mxu2 %v2646_v0  ;;  %1150 = vmatpush.msra.mxu3 %v2649_v55 }
 0x20a   :  { %1091 = vmatpush.msra.mxu0 %v2652_v22  ;;  %1111 = vmatpush.msra.mxu1 %v2655_v53 }
 0x20b   :  { %1131 = vmatpush.msra.mxu2 %v2658_v58  ;;  %1151 = vmatpush.msra.mxu3 %v2661_v50 }
 0x20c   :  { %1092 = vmatpush.msra.mxu0 %v2201_v25  ;;  %1112 = vmatpush.msra.mxu1 %v2203_v26  ;;  %v3238_v25 = vld [vmem:[#allocation26_spill] sm:$0xff]  ;;  %v3239_v26 = vld [vmem:[#allocation27_spill] sm:$0xff] }
 0x20d   :  { %1132 = vmatpush.msra.mxu2 %v2213_v27  ;;  %1152 = vmatpush.msra.mxu3 %v2215_v28  ;;  %v3240_v27 = vld [vmem:[#allocation28_spill] sm:$0xff]  ;;  %v3241_v28 = vld [vmem:[#allocation29_spill] sm:$0xff] }
 0x20e   :  { %1093 = vmatpush.msra.mxu0 %v2225_v29  ;;  %1113 = vmatpush.msra.mxu1 %v2227_v30  ;;  %v3242_v29 = vld [vmem:[#allocation30_spill] sm:$0xff]  ;;  %v3243_v30 = vld [vmem:[#allocation31_spill] sm:$0xff] }
 0x20f   :  { %1133 = vmatpush.msra.mxu2 %v2231_v31  ;;  %1153 = vmatpush.msra.mxu3 %v2233_v32  ;;  %v3244_v31 = vld [vmem:[#allocation32_spill] sm:$0xff]  ;;  %v3245_v32 = vld [vmem:[#allocation33_spill] sm:$0xff] }
 0x210   :  { %1094 = vmatpush.msra.mxu0 %v2237_v33  ;;  %1114 = vmatpush.msra.mxu1 %v2239_v34  ;;  %v3246_v33 = vld [vmem:[#allocation34_spill] sm:$0xff]  ;;  %v3247_v34 = vld [vmem:[#allocation35_spill] sm:$0xff] }
 0x211   :  { %1134 = vmatpush.msra.mxu2 %v2243_v35  ;;  %1154 = vmatpush.msra.mxu3 %v2245_v36  ;;  %v3248_v35 = vld [vmem:[#allocation36_spill] sm:$0xff] }
 0x212   :  { %1095 = vmatpush.msra.mxu0 %v2249_v37  ;;  %1115 = vmatpush.msra.mxu1 %v2251_v38 }
 0x213   :  { %1135 = vmatpush.msra.mxu2 %v2255_v39  ;;  %1155 = vmatpush.msra.mxu3 %v2257_v40  ;;  %v3249_v40 = vld [vmem:[#allocation41_spill] sm:$0xff] }
 0x214   :  { %1096 = vmatpush.msra.mxu0 %v2265_v41  ;;  %1116 = vmatpush.msra.mxu1 %v2267_v42  ;;  %v3250_v42 = vld [vmem:[#allocation42_spill] sm:$0xff] }
 0x215   :  { %1136 = vmatpush.msra.mxu2 %v2277_v43  ;;  %1156 = vmatpush.msra.mxu3 %v2279_v44 }
 0x216   :  { %1097 = vmatpush.msra.mxu0 %v2289_v45  ;;  %1117 = vmatpush.msra.mxu1 %v2291_v46 }
 0x217   :  { %1137 = vmatpush.msra.mxu2 %v3208_v7  ;;  %1157 = vmatpush.msra.mxu3 %v3209_v8  ;;  %v3251_v8 = vld [vmem:[#allocation43_spill] sm:$0xff] }
 0x218   :  { %1098 = vmatpush.msra.mxu0 %v3210_v10  ;;  %1118 = vmatpush.msra.mxu1 %v3211_v11 }
 0x219   :  { %1138 = vmatpush.msra.mxu2 %v3212_v12  ;;  %1158 = vmatpush.msra.mxu3 %v3213_v13 }
 0x21a   :  { %1099 = vmatpush.msra.mxu0 %v3214_v14  ;;  %1119 = vmatpush.msra.mxu1 %v3215_v15 }
 0x21b   :  { %1139 = vmatpush.msra.mxu2 %v3216_v16  ;;  %1159 = vmatpush.msra.mxu3 %v3217_v17 }
 0x21c   :  { %1100 = vmatpush.msra.mxu0 %v3218_v18  ;;  %1120 = vmatpush.msra.mxu1 %v3219_v19 }
 0x21d   :  { %1140 = vmatpush.msra.mxu2 %v3220_v20  ;;  %1160 = vmatpush.msra.mxu3 %v3221_v21  ;;  %v3252_v21 = vld [vmem:[#allocation44_spill] sm:$0xff] }
 0x21e   :  { %1101 = vmatpush.msra.mxu0 %v3222_v23  ;;  %1121 = vmatpush.msra.mxu1 %v3238_v25 }
 0x21f   :  { %1141 = vmatpush.msra.mxu2 %v3239_v26  ;;  %1161 = vmatpush.msra.mxu3 %v3240_v27 }
 0x220   :  { %1102 = vmatpush.msra.mxu0 %v3241_v28  ;;  %1122 = vmatpush.msra.mxu1 %v3242_v29 }
 0x221   :  { %1142 = vmatpush.msra.mxu2 %v3243_v30  ;;  %1162 = vmatpush.msra.mxu3 %v3244_v31  ;;  %v913_v31 = vrot.slane %v2613_v9, 6 }
 0x222   :  { %1103 = vmatpush.msra.mxu0 %v3245_v32  ;;  %1123 = vmatpush.msra.mxu1 %v3246_v33 }
 0x223   :  { %1143 = vmatpush.msra.mxu2 %v3247_v34  ;;  %1163 = vmatpush.msra.mxu3 %v3248_v35 }
 0x27f   :  { %v775_v36 = vpop.f32.mrf.mxu0  ;;  %v795_v37 = vpop.f32.mrf.mxu1 }
 0x280   :  { %v842_v38 = vrot.slane %v775_v36, 4  ;;  %v843_v39 = vrot.slane %v795_v37, 4 }
 0x282   :  { %v850_v41 = vadd.f32 %v842_v38, %v3249_v40  ;;  %v851_v43 = vadd.f32 %v843_v39, %v3250_v42 }
 0x284   :  { %v1779_v44 = vmul.f32 -1.442695, %v850_v41  ;;  %v1780_v45 = vmul.f32 -1.442695, %v851_v43 }
 0x286   :  { %1839 = vpow2.f32 %v1779_v44  ;;  %v815_v46 = vpop.f32.mrf.mxu2  ;;  %v835_v16 = vpop.f32.mrf.mxu3 }
 0x287   :  { %1841 = vpow2.f32 %v1780_v45  ;;  %v844_v7 = vrot.slane %v815_v46, 4  ;;  %v845_v17 = vrot.slane %v835_v16, 4  ;;  %v2739_v16 = vld [vmem:[#allocation5 + $0x168] sm:$0xff] }
 0x289   :  { %v852_v10 = vadd.f32 %v844_v7, %v3251_v8  ;;  %v853_v23 = vadd.f32 %v845_v17, %v3252_v21  ;;  %v2742_v17 = vld [vmem:[#allocation5 + $0x170] sm:$0xff] }
 0x28b   :  { %v1781_v11 = vmul.f32 -1.442695, %v852_v10 }
 0x28c   :  { %v1840_v12 = vpop.eup %1839 }
 0x28d   :  { %v1842_v13 = vpop.eup %1841  ;;  %v863_v14 = vadd.f32 1.0, %v1840_v12  ;;  %1843 = vpow2.f32 %v1781_v11 }
 0x28e   :  { %v864_v15 = vadd.f32 1.0, %v1842_v13 }
 0x28f   :  { %1845 = vrcp.f32 %v863_v14  ;;  %v877_v56 = vand.u32 2147483648, %v863_v14  ;;  %v875_v54 = vand.u32 2147483647, %v863_v14  ;;  %vm871_vm14 = vweird.f32 %v863_v14 }
 0x290   :  { %1847 = vrcp.f32 %v864_v15  ;;  %v892_v61 = vand.u32 2147483648, %v864_v15  ;;  %v890_v25 = vand.u32 2147483647, %v864_v15  ;;  %vm886_vm15 = vweird.f32 %v864_v15 }
 0x291   :  { %v878_v29 = vor.u32 1.1754944e-38, %v877_v56  ;;  %vm876_vm2 = vcmp.eq.f32.partialorder %v875_v54, 8.507059e+37  ;;  %v2772_v56 = vld [vmem:[#allocation5 + $0x100] sm:$0xff]  ;;  %v2781_v54 = vld [vmem:[#allocation5 + $0x118] sm:$0xff] }
 0x292   :  { %v893_v32 = vor.u32 1.1754944e-38, %v892_v61  ;;  %vm891_vm3 = vcmp.eq.f32.partialorder %v890_v25, 8.507059e+37  ;;  %v2775_v61 = vld [vmem:[#allocation5 + $0x108] sm:$0xff] }
 0x293   :  { %v1844_v18 = vpop.eup %1843  ;;  %v2787_v25 = vld [vmem:[#allocation5 + $0xe8] sm:$0xff] }
 0x294   :  { %v865_v19 = vadd.f32 1.0, %v1844_v18  ;;  %v2745_v18 = vld [vmem:[#allocation5 + $0x178] sm:$0xff] }
 0x295   :  { %v1846_v20 = vpop.eup %1845 }
 0x296   :  { %v1848_v51 = vpop.eup %1847  ;;  %v867_v6 = vmul.f32 %v1846_v20, %v863_v14  ;;  %1849 = vrcp.f32 %v865_v19  ;;  %vm872_vm12 = vweird.f32 %v1846_v20  ;;  %v907_v9 = vand.u32 2147483648, %v865_v19 }
 0x297   :  { %v882_v62 = vmul.f32 %v1848_v51, %v864_v15  ;;  %1851 = vtanh.f32 %v853_v23  ;;  %vm887_vm13 = vweird.f32 %v1848_v51  ;;  %vm873_vm0 = vmor %vm871_vm14, %vm872_vm12  ;;  %vm901_vm5 = vweird.f32 %v865_v19  ;;  %v2736_v15 = vld [vmem:[#allocation5 + $0x160] sm:$0xff]  ;;  %v2754_v23 = vld [vmem:[#allocation5 + $0x150] sm:$0xff] }
 0x298   :  { %v868_v3 = vsub.f32 1.0, %v867_v6  ;;  %vm888_vm1 = vmor %vm886_vm15, %vm887_vm13  ;;  %v905_v46 = vand.u32 2147483647, %v865_v19  ;;  %v908_v10 = vor.u32 1.1754944e-38, %v907_v9  ;;  %v2760_v6 = vld [vmem:[#allocation5 + $0x120] sm:$0xff]  ;;  %v2841_v9 = vld [vmem:[#allocation5 + $0x78] sm:$0xff] }
 0x299   :  { %v883_v59 = vsub.f32 1.0, %v882_v62  ;;  %v2763_v62 = vld [vmem:[#allocation5 + $0x128] sm:$0xff]  ;;  %3267 = vst [vmem:[#allocation25_spill] sm:$0xff] %v2841_v9 }
 0x29a   :  { %v869_v60 = vmul.f32 %v1846_v20, %v868_v3  ;;  %vm906_vm7 = vcmp.eq.f32.partialorder %v905_v46, 8.507059e+37  ;;  %v2766_v3 = vld [vmem:[#allocation5 + $0x130] sm:$0xff]  ;;  %v2844_v46 = vld [vmem:[#allocation5 + $0x40] sm:$0xff] }
 0x29b   :  { %v884_v57 = vmul.f32 %v1848_v51, %v883_v59  ;;  %v2769_v59 = vld [vmem:[#allocation5 + $0x138] sm:$0xff]  ;;  %3268 = vst [vmem:[#allocation26_spill] sm:$0xff] %v2844_v46 }
 0x29c   :  { %v1850_v26 = vpop.eup %1849  ;;  %v870_v27 = vadd.f32 %v1846_v20, %v869_v60  ;;  %v2778_v60 = vld [vmem:[#allocation5 + $0x110] sm:$0xff] }
 0x29d   :  { %v897_v28 = vmul.f32 %v1850_v26, %v865_v19  ;;  %v885_v30 = vadd.f32 %v1848_v51, %v884_v57  ;;  %v1852_v34 = vpop.eup %1851  ;;  %vm902_vm4 = vweird.f32 %v1850_v26  ;;  %v2748_v19 = vld [vmem:[#allocation5 + $0x140] sm:$0xff] }
 0x29e   :  { %v874_v33 = vsel %vm873_vm0, %v1846_v20, %v870_v27  ;;  %vm903_vm6 = vmor %vm901_vm5, %vm902_vm4  ;;  %v2751_v20 = vld [vmem:[#allocation5 + $0x148] sm:$0xff]  ;;  %v2784_v57 = vld [vmem:[#allocation5 + $0xe0] sm:$0xff] }
 0x29f   :  { %v898_v35 = vsub.f32 1.0, %v897_v28  ;;  %v879_v36 = vsel %vm876_vm2, %v878_v29, %v874_v33  ;;  %v889_v37 = vsel %vm888_vm1, %v1848_v51, %v885_v30  ;;  %v2757_v51 = vld [vmem:[#allocation5 + $0x158] sm:$0xff]  ;;  %v2796_v28 = vld [vmem:[#allocation5 + $0xc0] sm:$0xff]  ;;  %v2799_v29 = vld [vmem:[#allocation5 + $0xc8] sm:$0xff] }
 0x2a0   :  { %v894_v38 = vsel %vm891_vm3, %v893_v32, %v889_v37  ;;  %v916_v39 = vmul.f32 %v1852_v34, %v879_v36  ;;  %v2793_v27 = vld [vmem:[#allocation5 + $0xf8] sm:$0xff]  ;;  %3253 = vst [vmem:[#allocation11_spill] sm:$0xff] %v2799_v29  ;;  %v2802_v30 = vld [vmem:[#allocation5 + $0xd0] sm:$0xff]  ;;  %v2808_v32 = vld [vmem:[#allocation5 + $0xa0] sm:$0xff] }
 0x2a1   :  { %v915_v41 = vmul.f32 %v913_v31, %v894_v38  ;;  %v899_v43 = vmul.f32 %v1850_v26, %v898_v35  ;;  %3254 = vst [vmem:[#allocation12_spill] sm:$0xff] %v2802_v30  ;;  %v2805_v31 = vld [vmem:[#allocation5 + $0xd8] sm:$0xff]  ;;  %v2811_v33 = vld [vmem:[#allocation5 + $0xa8] sm:$0xff]  ;;  %v2814_v34 = vld [vmem:[#allocation5 + $0xb0] sm:$0xff] }
 0x2a2   :  { %3255 = vst [vmem:[#allocation13_spill] sm:$0xff] %v2805_v31  ;;  %v2817_v35 = vld [vmem:[#allocation5 + $0xb8] sm:$0xff]  ;;  %v2820_v36 = vld [vmem:[#allocation5 + $0x80] sm:$0xff]  ;;  %v2823_v37 = vld [vmem:[#allocation5 + $0x88] sm:$0xff] }
 0x2a3   :  { %v2717_v44 = vadd.f32 %v916_v39, %v915_v41  ;;  %v900_v45 = vadd.f32 %v1850_v26, %v899_v43  ;;  %3256 = vst [vmem:[#allocation14_spill] sm:$0xff] %v2808_v32  ;;  %v2826_v38 = vld [vmem:[#allocation5 + $0x90] sm:$0xff]  ;;  %v2829_v39 = vld [vmem:[#allocation5 + $0x98] sm:$0xff]  ;;  %v2832_v41 = vld [vmem:[#allocation5 + $0x60] sm:$0xff] }
 0x2a4   :  { %3257 = vst [vmem:[#allocation15_spill] sm:$0xff] %v2811_v33  ;;  %v2835_v43 = vld [vmem:[#allocation5 + $0x68] sm:$0xff] }
 0x2a5   :  { %1853 = vtanh.f32 %v2717_v44  ;;  %v904_v7 = vsel %vm903_vm6, %v1850_v26, %v900_v45  ;;  %v2790_v26 = vld [vmem:[#allocation5 + $0xf0] sm:$0xff]  ;;  %3258 = vst [vmem:[#allocation16_spill] sm:$0xff] %v2814_v34 }
 0x2a6   :  { %v909_v12 = vsel %vm906_vm7, %v908_v10, %v904_v7  ;;  %3259 = vst [vmem:[#allocation17_spill] sm:$0xff] %v2817_v35  ;;  %v2838_v45 = vld [vmem:[#allocation5 + $0x70] sm:$0xff]  ;;  %v2847_v7 = vld [vmem:[#allocation5 + $0x48] sm:$0xff] }
 0x2a7   :  { %3260 = vst [vmem:[#allocation18_spill] sm:$0xff] %v2820_v36  ;;  %v2850_v10 = vld [vmem:[#allocation5 + $0x50] sm:$0xff] }
 0x2a8   :  { %3261 = vst [vmem:[#allocation19_spill] sm:$0xff] %v2823_v37 }
 0x2a9   :  { %3262 = vst [vmem:[#allocation20_spill] sm:$0xff] %v2826_v38 }
 0x2aa   :  { %3263 = vst [vmem:[#allocation21_spill] sm:$0xff] %v2829_v39 }
 0x2ab   :  { %v1854_v11 = vpop.eup %1853  ;;  %3264 = vst [vmem:[#allocation22_spill] sm:$0xff] %v2832_v41 }
 0x2ac   :  { %v919_v13 = vmul.f32 %v1854_v11, %v909_v12  ;;  %3265 = vst [vmem:[#allocation23_spill] sm:$0xff] %v2835_v43  ;;  %v2853_v11 = vld [vmem:[#allocation5 + $0x58] sm:$0xff]  ;;  %v2856_v12 = vld [vmem:[#allocation5 + $0x20] sm:$0xff] }
 0x2ad   :  { %3266 = vst [vmem:[#allocation24_spill] sm:$0xff] %v2838_v45 }
 0x2ae   :  { %v921_v14 = vrot.slane %v919_v13, 4  ;;  %3269 = vst [vmem:[#allocation27_spill] sm:$0xff] %v2847_v7  ;;  %v2859_v13 = vld [vmem:[#allocation5 + $0x28] sm:$0xff] }
 0x2af   :  { %3270 = vst [vmem:[#allocation28_spill] sm:$0xff] %v2850_v10 }
 0x2b0   :  { %939 = vmatmul.f32.vlgmr.msrb.gmra.mxu0 %v921_v14  ;;  %959 = vmatmul.f32.vlgmr.msrb.gmra.mxu1 %v921_v14  ;;  %3271 = vst [vmem:[#allocation29_spill] sm:$0xff] %v2853_v11 }
 0x2b1   :  { %979 = vmatmul.f32.vlgmr.msrb.gmra.mxu2 %v921_v14  ;;  %999 = vmatmul.f32.vlgmr.msrb.gmra.mxu3 %v921_v14  ;;  %3272 = vst [vmem:[#allocation30_spill] sm:$0xff] %v2856_v12  ;;  %v2862_v14 = vld [vmem:[#allocation5 + $0x30] sm:$0xff] }
 0x2b2   :  { %1238 = vmatpush.msrb.mxu0 %v2616_v47  ;;  %1258 = vmatpush.msrb.mxu1 %v2619_v48  ;;  %3273 = vst [vmem:[#allocation31_spill] sm:$0xff] %v2859_v13 }
 0x2b3   :  { %1278 = vmatpush.msrb.mxu2 %v2622_v49  ;;  %1298 = vmatpush.msrb.mxu3 %v2625_v24  ;;  %3274 = vst [vmem:[#allocation32_spill] sm:$0xff] %v2862_v14 }
 0x2b4   :  { %1239 = vmatpush.msrb.mxu0 %v2628_v52  ;;  %1259 = vmatpush.msrb.mxu1 %v2631_v2 }
 0x2b5   :  { %1279 = vmatpush.msrb.mxu2 %v2634_v4  ;;  %1299 = vmatpush.msrb.mxu3 %v2637_v63 }
 0x2b6   :  { %1240 = vmatpush.msrb.mxu0 %v2640_v1  ;;  %1260 = vmatpush.msrb.mxu1 %v2643_v5 }
 0x2b7   :  { %1280 = vmatpush.msrb.mxu2 %v2646_v0  ;;  %1300 = vmatpush.msrb.mxu3 %v2649_v55 }
 0x2b8   :  { %1241 = vmatpush.msrb.mxu0 %v2652_v22  ;;  %1261 = vmatpush.msrb.mxu1 %v2655_v53 }
 0x2b9   :  { %1281 = vmatpush.msrb.mxu2 %v2658_v58  ;;  %1301 = vmatpush.msrb.mxu3 %v2661_v50 }
 0x2ba   :  { %1242 = vmatpush.msrb.mxu0 %v2736_v15  ;;  %1262 = vmatpush.msrb.mxu1 %v2739_v16 }
 0x2bb   :  { %1282 = vmatpush.msrb.mxu2 %v2742_v17  ;;  %1302 = vmatpush.msrb.mxu3 %v2745_v18 }
 0x2bc   :  { %1243 = vmatpush.msrb.mxu0 %v2748_v19  ;;  %1263 = vmatpush.msrb.mxu1 %v2751_v20 }
 0x2bd   :  { %1283 = vmatpush.msrb.mxu2 %v2754_v23  ;;  %1303 = vmatpush.msrb.mxu3 %v2757_v51 }
 0x2be   :  { %1244 = vmatpush.msrb.mxu0 %v2760_v6  ;;  %1264 = vmatpush.msrb.mxu1 %v2763_v62 }
 0x2bf   :  { %1284 = vmatpush.msrb.mxu2 %v2766_v3  ;;  %1304 = vmatpush.msrb.mxu3 %v2769_v59 }
 0x2c0   :  { %1245 = vmatpush.msrb.mxu0 %v2772_v56  ;;  %1265 = vmatpush.msrb.mxu1 %v2775_v61 }
 0x2c1   :  { %1285 = vmatpush.msrb.mxu2 %v2778_v60  ;;  %1305 = vmatpush.msrb.mxu3 %v2781_v54 }
 0x2c2   :  { %1246 = vmatpush.msrb.mxu0 %v2784_v57  ;;  %1266 = vmatpush.msrb.mxu1 %v2787_v25 }
 0x2c3   :  { %1286 = vmatpush.msrb.mxu2 %v2790_v26  ;;  %1306 = vmatpush.msrb.mxu3 %v2793_v27 }
 0x2c4   :  { %1247 = vmatpush.msrb.mxu0 %v2796_v28  ;;  %1267 = vmatpush.msrb.mxu1 %v2799_v29 }
 0x2c5   :  { %1287 = vmatpush.msrb.mxu2 %v2802_v30  ;;  %1307 = vmatpush.msrb.mxu3 %v2805_v31 }
 0x2c6   :  { %1248 = vmatpush.msrb.mxu0 %v2808_v32  ;;  %1268 = vmatpush.msrb.mxu1 %v2811_v33 }
 0x2c7   :  { %1288 = vmatpush.msrb.mxu2 %v2814_v34  ;;  %1308 = vmatpush.msrb.mxu3 %v2817_v35 }
 0x2c8   :  { %1249 = vmatpush.msrb.mxu0 %v2820_v36  ;;  %1269 = vmatpush.msrb.mxu1 %v2823_v37 }
 0x2c9   :  { %1289 = vmatpush.msrb.mxu2 %v2826_v38  ;;  %1309 = vmatpush.msrb.mxu3 %v2829_v39 }
 0x2ca   :  { %1250 = vmatpush.msrb.mxu0 %v2832_v41  ;;  %1270 = vmatpush.msrb.mxu1 %v2835_v43 }
 0x2cb   :  { %1290 = vmatpush.msrb.mxu2 %v2838_v45  ;;  %1310 = vmatpush.msrb.mxu3 %v2841_v9 }
 0x2cc   :  { %1251 = vmatpush.msrb.mxu0 %v2844_v46  ;;  %1271 = vmatpush.msrb.mxu1 %v2847_v7  ;;  %v2865_v7 = vld [vmem:[#allocation5 + $0x38] sm:$0xff] }
 0x2cd   :  { %1291 = vmatpush.msrb.mxu2 %v2850_v10  ;;  %1311 = vmatpush.msrb.mxu3 %v2853_v11  ;;  %3275 = vst [vmem:[#allocation33_spill] sm:$0xff] %v2865_v7  ;;  %v2868_v10 = vld [vmem:[#allocation5] sm:$0xff]  ;;  %v2871_v11 = vld [vmem:[#allocation5 + $0x8] sm:$0xff] }
 0x2ce   :  { %1252 = vmatpush.msrb.mxu0 %v2856_v12  ;;  %1272 = vmatpush.msrb.mxu1 %v2859_v13  ;;  %3276 = vst [vmem:[#allocation34_spill] sm:$0xff] %v2868_v10  ;;  %v2874_v12 = vld [vmem:[#allocation5 + $0x10] sm:$0xff]  ;;  %v2877_v13 = vld [vmem:[#allocation5 + $0x18] sm:$0xff] }
 0x2cf   :  { %1292 = vmatpush.msrb.mxu2 %v2862_v14  ;;  %1312 = vmatpush.msrb.mxu3 %v2865_v7  ;;  %3277 = vst [vmem:[#allocation35_spill] sm:$0xff] %v2871_v11 }
 0x2d0   :  { %1253 = vmatpush.msrb.mxu0 %v2868_v10  ;;  %1273 = vmatpush.msrb.mxu1 %v2871_v11  ;;  %3278 = vst [vmem:[#allocation36_spill] sm:$0xff] %v2874_v12 }
 0x2d1   :  { %1293 = vmatpush.msrb.mxu2 %v2874_v12  ;;  %3279 = vst [vmem:[#allocation41_spill] sm:$0xff] %v2877_v13  ;;  %1313 = vmatpush.msrb.mxu3 %v2877_v13 }
 0x32d   :  { %v940_v14 = vpop.f32.mrf.mxu0  ;;  %v960_v46 = vpop.f32.mrf.mxu1 }
 0x32e   :  { %v1007_v9 = vrot.slane %v940_v14, 2  ;;  %v1008_v7 = vrot.slane %v960_v46, 2 }
 0x330   :  { %v1015_v45 = vadd.f32 %v1007_v9, %v3249_v40  ;;  %v1016_v10 = vadd.f32 %v1008_v7, %v3250_v42 }
 0x332   :  { %v1782_v43 = vmul.f32 -1.442695, %v1015_v45  ;;  %v1783_v41 = vmul.f32 -1.442695, %v1016_v10 }
 0x334   :  { %1855 = vpow2.f32 %v1782_v43  ;;  %v980_v11 = vpop.f32.mrf.mxu2  ;;  %v1000_v14 = vpop.f32.mrf.mxu3 }
 0x335   :  { %1857 = vpow2.f32 %v1783_v41  ;;  %v1009_v39 = vrot.slane %v980_v11, 2  ;;  %v1010_v40 = vrot.slane %v1000_v14, 2 }
 0x337   :  { %v1017_v12 = vadd.f32 %v1009_v39, %v3251_v8  ;;  %v1018_v43 = vadd.f32 %v1010_v40, %v3252_v21 }
 0x339   :  { %v1784_v38 = vmul.f32 -1.442695, %v1017_v12 }
 0x33a   :  { %v1856_v37 = vpop.eup %1855 }
 0x33b   :  { %v1858_v36 = vpop.eup %1857  ;;  %v1028_v13 = vadd.f32 1.0, %v1856_v37  ;;  %1859 = vpow2.f32 %v1784_v38 }
 0x33c   :  { %v1029_v35 = vadd.f32 1.0, %v1858_v36 }
 0x33d   :  { %1861 = vrcp.f32 %v1028_v13  ;;  %v1042_v10 = vand.u32 2147483648, %v1028_v13  ;;  %v1040_v36 = vand.u32 2147483647, %v1028_v13  ;;  %vm1036_vm10 = vweird.f32 %v1028_v13 }
 0x33e   :  { %1863 = vrcp.f32 %v1029_v35  ;;  %v1057_v37 = vand.u32 2147483648, %v1029_v35  ;;  %v1055_v12 = vand.u32 2147483647, %v1029_v35  ;;  %vm1051_vm11 = vweird.f32 %v1029_v35 }
 0x33f   :  { %v1043_v40 = vor.u32 1.1754944e-38, %v1042_v10  ;;  %vm1041_vm14 = vcmp.eq.f32.partialorder %v1040_v36, 8.507059e+37 }
 0x340   :  { %vm1056_vm15 = vcmp.eq.f32.partialorder %v1055_v12, 8.507059e+37  ;;  %v3286_v12 = vld [vmem:[#allocation17_spill] sm:$0xff] }
 0x341   :  { %v1860_v9 = vpop.eup %1859 }
 0x342   :  { %v1030_v42 = vadd.f32 1.0, %v1860_v9 }
 0x343   :  { %v1862_v45 = vpop.eup %1861 }
 0x344   :  { %v1864_v46 = vpop.eup %1863  ;;  %v1032_v41 = vmul.f32 %v1862_v45, %v1028_v13  ;;  %1865 = vrcp.f32 %v1030_v42  ;;  %vm1037_vm8 = vweird.f32 %v1862_v45  ;;  %vm1066_vm1 = vweird.f32 %v1030_v42 }
 0x345   :  { %v1047_v7 = vmul.f32 %v1864_v46, %v1029_v35  ;;  %1867 = vtanh.f32 %v1018_v43  ;;  %vm1052_vm9 = vweird.f32 %v1864_v46  ;;  %vm1038_vm12 = vmor %vm1036_vm10, %vm1037_vm8  ;;  %v1070_v10 = vand.u32 2147483647, %v1030_v42 }
 0x346   :  { %v1033_v8 = vsub.f32 1.0, %v1032_v41  ;;  %v1078_v41 = vrot.slane %v2717_v44, 6  ;;  %vm1053_vm13 = vmor %vm1051_vm11, %vm1052_vm9  ;;  %v1072_v44 = vand.u32 2147483648, %v1030_v42 }
 0x347   :  { %v1048_v39 = vsub.f32 1.0, %v1047_v7  ;;  %v1058_v7 = vor.u32 1.1754944e-38, %v1057_v37  ;;  %vm1071_vm3 = vcmp.eq.f32.partialorder %v1070_v10, 8.507059e+37  ;;  %v3299_v10 = vld [vmem:[#allocation30_spill] sm:$0xff] }
 0x348   :  { %v1034_v38 = vmul.f32 %v1862_v45, %v1033_v8  ;;  %v1073_v37 = vor.u32 1.1754944e-38, %v1072_v44  ;;  %v3298_v44 = vld [vmem:[#allocation29_spill] sm:$0xff] }
 0x349   :  { %v1049_v11 = vmul.f32 %v1864_v46, %v1048_v39 }
 0x34a   :  { %v1866_v14 = vpop.eup %1865  ;;  %v1035_v9 = vadd.f32 %v1862_v45, %v1034_v38 }
 0x34b   :  { %v1062_v21 = vmul.f32 %v1866_v14, %v1030_v42  ;;  %v1050_v34 = vadd.f32 %v1864_v46, %v1049_v11  ;;  %v1868_v8 = vpop.eup %1867  ;;  %vm1067_vm0 = vweird.f32 %v1866_v14  ;;  %v3285_v42 = vld [vmem:[#allocation16_spill] sm:$0xff] }
 0x34c   :  { %v1039_v43 = vsel %vm1038_vm12, %v1862_v45, %v1035_v9  ;;  %vm1068_vm2 = vmor %vm1066_vm1, %vm1067_vm0  ;;  %v3288_v9 = vld [vmem:[#allocation19_spill] sm:$0xff] }
 0x34d   :  { %v1063_v33 = vsub.f32 1.0, %v1062_v21  ;;  %v1044_v32 = vsel %vm1041_vm14, %v1043_v40, %v1039_v43  ;;  %v1054_v39 = vsel %vm1053_vm13, %v1864_v46, %v1050_v34  ;;  %v3289_v21 = vld [vmem:[#allocation20_spill] sm:$0xff]  ;;  %v3290_v40 = vld [vmem:[#allocation21_spill] sm:$0xff] }
 0x34e   :  { %v1059_v31 = vsel %vm1056_vm15, %v1058_v7, %v1054_v39  ;;  %v1081_v30 = vmul.f32 %v1868_v8, %v1044_v32  ;;  %v3283_v32 = vld [vmem:[#allocation14_spill] sm:$0xff]  ;;  %v3292_v7 = vld [vmem:[#allocation23_spill] sm:$0xff]  ;;  %v3293_v43 = vld [vmem:[#allocation24_spill] sm:$0xff] }
 0x34f   :  { %v1080_v38 = vmul.f32 %v1078_v41, %v1059_v31  ;;  %v1064_v13 = vmul.f32 %v1866_v14, %v1063_v33  ;;  %v3282_v31 = vld [vmem:[#allocation13_spill] sm:$0xff]  ;;  %v3284_v33 = vld [vmem:[#allocation15_spill] sm:$0xff]  ;;  %v3291_v41 = vld [vmem:[#allocation22_spill] sm:$0xff] }
 0x350   :  { %v3294_v8 = vld [vmem:[#allocation25_spill] sm:$0xff]  ;;  %v3295_v39 = vld [vmem:[#allocation26_spill] sm:$0xff] }
 0x351   :  { %v2885_v35 = vadd.f32 %v1081_v30, %v1080_v38  ;;  %v1065_v29 = vadd.f32 %v1866_v14, %v1064_v13  ;;  %v3281_v30 = vld [vmem:[#allocation12_spill] sm:$0xff]  ;;  %v3296_v38 = vld [vmem:[#allocation27_spill] sm:$0xff] }
 0x352   :  { %v3297_v13 = vld [vmem:[#allocation28_spill] sm:$0xff] }
 0x353   :  { %1869 = vtanh.f32 %v2885_v35  ;;  %v1069_v45 = vsel %vm1068_vm2, %v1866_v14, %v1065_v29  ;;  %v3280_v29 = vld [vmem:[#allocation11_spill] sm:$0xff]  ;;  %v3287_v14 = vld [vmem:[#allocation18_spill] sm:$0xff] }
 0x354   :  { %v1074_v34 = vsel %vm1071_vm3, %v1073_v37, %v1069_v45  ;;  %v3300_v45 = vld [vmem:[#allocation31_spill] sm:$0xff]  ;;  %v3301_v37 = vld [vmem:[#allocation32_spill] sm:$0xff] }
 0x359   :  { %v1870_v36 = vpop.eup %1869 }
 0x35a   :  { %v1084_v46 = vmul.f32 %v1870_v36, %v1074_v34  ;;  %v3302_v36 = vld [vmem:[#allocation33_spill] sm:$0xff]  ;;  %v3303_v34 = vld [vmem:[#allocation34_spill] sm:$0xff] }
 0x35c   :  { %v1086_v11 = vrot.slane %v1084_v46, 6  ;;  %v3304_v46 = vld [vmem:[#allocation35_spill] sm:$0xff] }
 0x35e   :  { %1104 = vmatmul.f32.vlgmr.msra.gmra.mxu0 %v1086_v11  ;;  %1124 = vmatmul.f32.vlgmr.msra.gmra.mxu1 %v1086_v11 }
 0x35f   :  { %1144 = vmatmul.f32.vlgmr.msra.gmra.mxu2 %v1086_v11  ;;  %1164 = vmatmul.f32.vlgmr.msra.gmra.mxu3 %v1086_v11  ;;  %v3305_v11 = vld [vmem:[#allocation36_spill] sm:$0xff] }
 0x360   :  { %1403 = vmatpush.msra.mxu0 %v2616_v47  ;;  %1423 = vmatpush.msra.mxu1 %v2619_v48 }
 0x361   :  { %1443 = vmatpush.msra.mxu2 %v2622_v49  ;;  %1463 = vmatpush.msra.mxu3 %v2625_v24 }
 0x362   :  { %1404 = vmatpush.msra.mxu0 %v2628_v52  ;;  %1424 = vmatpush.msra.mxu1 %v2631_v2 }
 0x363   :  { %1444 = vmatpush.msra.mxu2 %v2634_v4  ;;  %1464 = vmatpush.msra.mxu3 %v2637_v63 }
 0x364   :  { %1405 = vmatpush.msra.mxu0 %v2640_v1  ;;  %1425 = vmatpush.msra.mxu1 %v2643_v5 }
 0x365   :  { %1445 = vmatpush.msra.mxu2 %v2646_v0  ;;  %1465 = vmatpush.msra.mxu3 %v2649_v55 }
 0x366   :  { %1406 = vmatpush.msra.mxu0 %v2652_v22  ;;  %1426 = vmatpush.msra.mxu1 %v2655_v53 }
 0x367   :  { %1446 = vmatpush.msra.mxu2 %v2658_v58  ;;  %1466 = vmatpush.msra.mxu3 %v2661_v50 }
 0x368   :  { %1407 = vmatpush.msra.mxu0 %v2736_v15  ;;  %1427 = vmatpush.msra.mxu1 %v2739_v16 }
 0x369   :  { %1447 = vmatpush.msra.mxu2 %v2742_v17  ;;  %1467 = vmatpush.msra.mxu3 %v2745_v18 }
 0x36a   :  { %1408 = vmatpush.msra.mxu0 %v2748_v19  ;;  %1428 = vmatpush.msra.mxu1 %v2751_v20 }
 0x36b   :  { %1448 = vmatpush.msra.mxu2 %v2754_v23  ;;  %1468 = vmatpush.msra.mxu3 %v2757_v51 }
 0x36c   :  { %1409 = vmatpush.msra.mxu0 %v2760_v6  ;;  %1429 = vmatpush.msra.mxu1 %v2763_v62 }
 0x36d   :  { %1449 = vmatpush.msra.mxu2 %v2766_v3  ;;  %1469 = vmatpush.msra.mxu3 %v2769_v59 }
 0x36e   :  { %1410 = vmatpush.msra.mxu0 %v2772_v56  ;;  %1430 = vmatpush.msra.mxu1 %v2775_v61 }
 0x36f   :  { %1450 = vmatpush.msra.mxu2 %v2778_v60  ;;  %1470 = vmatpush.msra.mxu3 %v2781_v54 }
 0x370   :  { %1411 = vmatpush.msra.mxu0 %v2784_v57  ;;  %1431 = vmatpush.msra.mxu1 %v2787_v25 }
 0x371   :  { %1451 = vmatpush.msra.mxu2 %v2790_v26  ;;  %1471 = vmatpush.msra.mxu3 %v2793_v27 }
 0x372   :  { %1412 = vmatpush.msra.mxu0 %v2796_v28  ;;  %1432 = vmatpush.msra.mxu1 %v3280_v29 }
 0x373   :  { %1452 = vmatpush.msra.mxu2 %v3281_v30  ;;  %1472 = vmatpush.msra.mxu3 %v3282_v31 }
 0x374   :  { %1413 = vmatpush.msra.mxu0 %v3283_v32  ;;  %1433 = vmatpush.msra.mxu1 %v3284_v33 }
 0x375   :  { %1453 = vmatpush.msra.mxu2 %v3285_v42  ;;  %1473 = vmatpush.msra.mxu3 %v3286_v12 }
 0x376   :  { %1414 = vmatpush.msra.mxu0 %v3287_v14  ;;  %1434 = vmatpush.msra.mxu1 %v3288_v9 }
 0x377   :  { %1454 = vmatpush.msra.mxu2 %v3289_v21  ;;  %1474 = vmatpush.msra.mxu3 %v3290_v40 }
 0x378   :  { %1415 = vmatpush.msra.mxu0 %v3291_v41  ;;  %1435 = vmatpush.msra.mxu1 %v3292_v7 }
 0x379   :  { %1455 = vmatpush.msra.mxu2 %v3293_v43  ;;  %1475 = vmatpush.msra.mxu3 %v3294_v8  ;;  %v3307_v8 = vld [vmem:[#allocation37_spill] sm:$0xff]  ;;  %v3308_v43 = vld [vmem:[#allocation38_spill] sm:$0xff] }
 0x37a   :  { %1416 = vmatpush.msra.mxu0 %v3295_v39  ;;  %1436 = vmatpush.msra.mxu1 %v3296_v38  ;;  %v3306_v39 = vld [vmem:[#allocation41_spill] sm:$0xff] }
 0x37b   :  { %1456 = vmatpush.msra.mxu2 %v3297_v13  ;;  %1476 = vmatpush.msra.mxu3 %v3298_v44 }
 0x37c   :  { %1417 = vmatpush.msra.mxu0 %v3299_v10  ;;  %1437 = vmatpush.msra.mxu1 %v3300_v45 }
 0x37d   :  { %1457 = vmatpush.msra.mxu2 %v3301_v37  ;;  %1477 = vmatpush.msra.mxu3 %v3302_v36  ;;  %v3309_v36 = vld [vmem:[#allocation39_spill] sm:$0xff] }
 0x37e   :  { %1418 = vmatpush.msra.mxu0 %v3303_v34  ;;  %1438 = vmatpush.msra.mxu1 %v3304_v46 }
 0x37f   :  { %1458 = vmatpush.msra.mxu2 %v3305_v11  ;;  %1478 = vmatpush.msra.mxu3 %v3306_v39 }
 0x3db   :  { %v1105_v38 = vpop.f32.mrf.mxu0  ;;  %v1125_v13 = vpop.f32.mrf.mxu1 }
 0x3dc   :  { %v1168_v44 = vadd.f32 %v1105_v38, %v3307_v8  ;;  %v1169_v10 = vadd.f32 %v1125_v13, %v3308_v43  ;;  %v3310_v13 = vld [vmem:[#allocation40_spill] sm:$0xff] }
 0x3de   :  { %v1785_v7 = vmul.f32 -1.442695, %v1168_v44  ;;  %v1786_v45 = vmul.f32 -1.442695, %v1169_v10 }
 0x3e0   :  { %1871 = vpow2.f32 %v1785_v7 }
 0x3e1   :  { %1873 = vpow2.f32 %v1786_v45 }
 0x3e2   :  { %v1145_v37 = vpop.f32.mrf.mxu2  ;;  %v1165_v39 = vpop.f32.mrf.mxu3 }
 0x3e3   :  { %v1170_v41 = vadd.f32 %v1145_v37, %v3309_v36  ;;  %v1171_v44 = vadd.f32 %v1165_v39, %v3310_v13 }
 0x3e5   :  { %v1787_v34 = vmul.f32 -1.442695, %v1170_v41 }
 0x3e6   :  { %v1872_v40 = vpop.eup %1871 }
 0x3e7   :  { %v1874_v46 = vpop.eup %1873  ;;  %v1181_v21 = vadd.f32 1.0, %v1872_v40  ;;  %1875 = vpow2.f32 %v1787_v34 }
 0x3e8   :  { %v1182_v11 = vadd.f32 1.0, %v1874_v46 }
 0x3e9   :  { %1877 = vrcp.f32 %v1181_v21  ;;  %v1195_v41 = vand.u32 2147483648, %v1181_v21  ;;  %v1193_v34 = vand.u32 2147483647, %v1181_v21  ;;  %vm1189_vm6 = vweird.f32 %v1181_v21 }
 0x3ea   :  { %1879 = vrcp.f32 %v1182_v11  ;;  %v1210_v36 = vand.u32 2147483648, %v1182_v11  ;;  %v1208_v14 = vand.u32 2147483647, %v1182_v11  ;;  %vm1204_vm7 = vweird.f32 %v1182_v11 }
 0x3eb   :  { %v1196_v13 = vor.u32 1.1754944e-38, %v1195_v41  ;;  %vm1194_vm10 = vcmp.eq.f32.partialorder %v1193_v34, 8.507059e+37 }
 0x3ec   :  { %vm1209_vm11 = vcmp.eq.f32.partialorder %v1208_v14, 8.507059e+37 }
 0x3ed   :  { %v1876_v9 = vpop.eup %1875 }
 0x3ee   :  { %v1183_v38 = vadd.f32 1.0, %v1876_v9 }
 0x3ef   :  { %v1878_v8 = vpop.eup %1877 }
 0x3f0   :  { %v1880_v10 = vpop.eup %1879  ;;  %v1185_v7 = vmul.f32 %v1878_v8, %v1181_v21  ;;  %1881 = vrcp.f32 %v1183_v38  ;;  %vm1190_vm4 = vweird.f32 %v1878_v8  ;;  %vm1219_vm13 = vweird.f32 %v1183_v38 }
 0x3f1   :  { %v1200_v45 = vmul.f32 %v1880_v10, %v1182_v11  ;;  %1883 = vtanh.f32 %v1171_v44  ;;  %vm1205_vm5 = vweird.f32 %v1880_v10  ;;  %vm1191_vm8 = vmor %vm1189_vm6, %vm1190_vm4  ;;  %v1231_v44 = vrot.slane %v2885_v35, 6 }
 0x3f2   :  { %v1186_v43 = vsub.f32 1.0, %v1185_v7  ;;  %vm1206_vm9 = vmor %vm1204_vm7, %vm1205_vm5  ;;  %v1211_v7 = vor.u32 1.1754944e-38, %v1210_v36  ;;  %v1225_v36 = vand.u32 2147483648, %v1183_v38 }
 0x3f3   :  { %v1201_v37 = vsub.f32 1.0, %v1200_v45 }
 0x3f4   :  { %v1187_v40 = vmul.f32 %v1878_v8, %v1186_v43  ;;  %v1226_v41 = vor.u32 1.1754944e-38, %v1225_v36 }
 0x3f5   :  { %v1202_v46 = vmul.f32 %v1880_v10, %v1201_v37 }
 0x3f6   :  { %v1882_v12 = vpop.eup %1881  ;;  %v1188_v9 = vadd.f32 %v1878_v8, %v1187_v40 }
 0x3f7   :  { %v1215_v39 = vmul.f32 %v1882_v12, %v1183_v38  ;;  %v1203_v42 = vadd.f32 %v1880_v10, %v1202_v46  ;;  %v1884_v43 = vpop.eup %1883  ;;  %vm1220_vm12 = vweird.f32 %v1882_v12 }
 0x3f8   :  { %v1192_v45 = vsel %vm1191_vm8, %v1878_v8, %v1188_v9  ;;  %v1223_v8 = vand.u32 2147483647, %v1183_v38  ;;  %vm1221_vm14 = vmor %vm1219_vm13, %vm1220_vm12 }
 0x3f9   :  { %v1216_v33 = vsub.f32 1.0, %v1215_v39  ;;  %v1197_v32 = vsel %vm1194_vm10, %v1196_v13, %v1192_v45  ;;  %v1207_v37 = vsel %vm1206_vm9, %v1880_v10, %v1203_v42 }
 0x3fa   :  { %v1212_v31 = vsel %vm1209_vm11, %v1211_v7, %v1207_v37  ;;  %v1234_v30 = vmul.f32 %v1884_v43, %v1197_v32  ;;  %vm1224_vm15 = vcmp.eq.f32.partialorder %v1223_v8, 8.507059e+37 }
 0x3fb   :  { %v1233_v40 = vmul.f32 %v1231_v44, %v1212_v31  ;;  %v1217_v21 = vmul.f32 %v1882_v12, %v1216_v33  ;;  %v3340_v31 = vld [vmem:[#allocation39_spill] sm:$0xff]  ;;  %v3341_v44 = vld [vmem:[#allocation40_spill] sm:$0xff] }
 0x3fd   :  { %v2957_v11 = vadd.f32 %v1234_v30, %v1233_v40  ;;  %v1218_v29 = vadd.f32 %v1882_v12, %v1217_v21 }
 0x3ff   :  { %1885 = vtanh.f32 %v2957_v11  ;;  %v1222_v35 = vsel %vm1221_vm14, %v1882_v12, %v1218_v29 }
 0x400   :  { %v1227_v42 = vsel %vm1224_vm15, %v1226_v41, %v1222_v35 }
 0x405   :  { %v1886_v13 = vpop.eup %1885 }
 0x406   :  { %v1237_v14 = vmul.f32 %v1886_v13, %v1227_v42 }
 0x408   :  { %1254 = vmatmul.f32.vlgmr.msrb.gmra.mxu0 %v1237_v14  ;;  %1274 = vmatmul.f32.vlgmr.msrb.gmra.mxu1 %v1237_v14 }
 0x409   :  { %1294 = vmatmul.f32.vlgmr.msrb.gmra.mxu2 %v1237_v14  ;;  %1314 = vmatmul.f32.vlgmr.msrb.gmra.mxu3 %v1237_v14 }
 0x40a   :  { %1568 = vmatpush.msrb.mxu0 %v2616_v47  ;;  %1588 = vmatpush.msrb.mxu1 %v2619_v48  ;;  %v3311_v47 = vld [vmem:[#allocation11_spill] sm:$0xff]  ;;  %v3312_v48 = vld [vmem:[#allocation12_spill] sm:$0xff] }
 0x40b   :  { %1608 = vmatpush.msrb.mxu2 %v2622_v49  ;;  %1628 = vmatpush.msrb.mxu3 %v2625_v24  ;;  %v3313_v49 = vld [vmem:[#allocation13_spill] sm:$0xff]  ;;  %v3314_v24 = vld [vmem:[#allocation14_spill] sm:$0xff] }
 0x40c   :  { %1569 = vmatpush.msrb.mxu0 %v2628_v52  ;;  %1589 = vmatpush.msrb.mxu1 %v2631_v2  ;;  %v3315_v52 = vld [vmem:[#allocation15_spill] sm:$0xff]  ;;  %v3316_v2 = vld [vmem:[#allocation16_spill] sm:$0xff] }
 0x40d   :  { %1609 = vmatpush.msrb.mxu2 %v2634_v4  ;;  %1629 = vmatpush.msrb.mxu3 %v2637_v63  ;;  %v3317_v4 = vld [vmem:[#allocation17_spill] sm:$0xff]  ;;  %v3318_v63 = vld [vmem:[#allocation18_spill] sm:$0xff] }
 0x40e   :  { %1570 = vmatpush.msrb.mxu0 %v2640_v1  ;;  %1590 = vmatpush.msrb.mxu1 %v2643_v5  ;;  %v3319_v1 = vld [vmem:[#allocation19_spill] sm:$0xff]  ;;  %v3320_v5 = vld [vmem:[#allocation20_spill] sm:$0xff] }
 0x40f   :  { %1610 = vmatpush.msrb.mxu2 %v2646_v0  ;;  %1630 = vmatpush.msrb.mxu3 %v2649_v55  ;;  %v3321_v0 = vld [vmem:[#allocation21_spill] sm:$0xff]  ;;  %v3322_v55 = vld [vmem:[#allocation22_spill] sm:$0xff] }
 0x410   :  { %1571 = vmatpush.msrb.mxu0 %v2652_v22  ;;  %1591 = vmatpush.msrb.mxu1 %v2655_v53  ;;  %v3323_v22 = vld [vmem:[#allocation23_spill] sm:$0xff]  ;;  %v3324_v53 = vld [vmem:[#allocation24_spill] sm:$0xff] }
 0x411   :  { %1611 = vmatpush.msrb.mxu2 %v2658_v58  ;;  %1631 = vmatpush.msrb.mxu3 %v2661_v50  ;;  %v3325_v58 = vld [vmem:[#allocation25_spill] sm:$0xff]  ;;  %v3326_v50 = vld [vmem:[#allocation26_spill] sm:$0xff] }
 0x412   :  { %1572 = vmatpush.msrb.mxu0 %v2736_v15  ;;  %1592 = vmatpush.msrb.mxu1 %v2739_v16  ;;  %v3327_v15 = vld [vmem:[#allocation27_spill] sm:$0xff]  ;;  %v3328_v16 = vld [vmem:[#allocation28_spill] sm:$0xff] }
 0x413   :  { %1612 = vmatpush.msrb.mxu2 %v2742_v17  ;;  %1632 = vmatpush.msrb.mxu3 %v2745_v18  ;;  %v3329_v17 = vld [vmem:[#allocation29_spill] sm:$0xff]  ;;  %v3330_v18 = vld [vmem:[#allocation30_spill] sm:$0xff] }
 0x414   :  { %1573 = vmatpush.msrb.mxu0 %v2748_v19  ;;  %1593 = vmatpush.msrb.mxu1 %v2751_v20  ;;  %v3331_v19 = vld [vmem:[#allocation31_spill] sm:$0xff]  ;;  %v3332_v20 = vld [vmem:[#allocation32_spill] sm:$0xff] }
 0x415   :  { %1613 = vmatpush.msrb.mxu2 %v2754_v23  ;;  %1633 = vmatpush.msrb.mxu3 %v2757_v51  ;;  %v3333_v23 = vld [vmem:[#allocation33_spill] sm:$0xff]  ;;  %v3334_v51 = vld [vmem:[#allocation34_spill] sm:$0xff] }
 0x416   :  { %1574 = vmatpush.msrb.mxu0 %v2760_v6  ;;  %1594 = vmatpush.msrb.mxu1 %v2763_v62  ;;  %v3335_v6 = vld [vmem:[#allocation35_spill] sm:$0xff]  ;;  %v3336_v62 = vld [vmem:[#allocation36_spill] sm:$0xff] }
 0x417   :  { %1614 = vmatpush.msrb.mxu2 %v2766_v3  ;;  %1634 = vmatpush.msrb.mxu3 %v2769_v59  ;;  %v3337_v3 = vld [vmem:[#allocation41_spill] sm:$0xff] }
 0x418   :  { %1575 = vmatpush.msrb.mxu0 %v2772_v56  ;;  %1595 = vmatpush.msrb.mxu1 %v2775_v61 }
 0x419   :  { %1615 = vmatpush.msrb.mxu2 %v2778_v60  ;;  %1635 = vmatpush.msrb.mxu3 %v2781_v54  ;;  %v3338_v54 = vld [vmem:[#allocation37_spill] sm:$0xff] }
 0x41a   :  { %1576 = vmatpush.msrb.mxu0 %v2784_v57  ;;  %1596 = vmatpush.msrb.mxu1 %v2787_v25  ;;  %v3339_v25 = vld [vmem:[#allocation38_spill] sm:$0xff] }
 0x41b   :  { %1616 = vmatpush.msrb.mxu2 %v2790_v26  ;;  %1636 = vmatpush.msrb.mxu3 %v2793_v27 }
 0x41c   :  { %1577 = vmatpush.msrb.mxu0 %v2796_v28  ;;  %1597 = vmatpush.msrb.mxu1 %v3311_v47 }
 0x41d   :  { %1617 = vmatpush.msrb.mxu2 %v3312_v48  ;;  %1637 = vmatpush.msrb.mxu3 %v3313_v49 }
 0x41e   :  { %1578 = vmatpush.msrb.mxu0 %v3314_v24  ;;  %1598 = vmatpush.msrb.mxu1 %v3315_v52 }
 0x41f   :  { %1618 = vmatpush.msrb.mxu2 %v3316_v2  ;;  %1638 = vmatpush.msrb.mxu3 %v3317_v4  ;;  %v1393_v4 = vrot.slane %v2957_v11, 6 }
 0x420   :  { %1579 = vmatpush.msrb.mxu0 %v3318_v63  ;;  %1599 = vmatpush.msrb.mxu1 %v3319_v1 }
 0x421   :  { %1619 = vmatpush.msrb.mxu2 %v3320_v5  ;;  %1639 = vmatpush.msrb.mxu3 %v3321_v0 }
 0x422   :  { %1580 = vmatpush.msrb.mxu0 %v3322_v55  ;;  %1600 = vmatpush.msrb.mxu1 %v3323_v22 }
 0x423   :  { %1620 = vmatpush.msrb.mxu2 %v3324_v53  ;;  %1640 = vmatpush.msrb.mxu3 %v3325_v58 }
 0x424   :  { %1581 = vmatpush.msrb.mxu0 %v3326_v50  ;;  %1601 = vmatpush.msrb.mxu1 %v3327_v15 }
 0x425   :  { %1621 = vmatpush.msrb.mxu2 %v3328_v16  ;;  %1641 = vmatpush.msrb.mxu3 %v3329_v17 }
 0x426   :  { %1582 = vmatpush.msrb.mxu0 %v3330_v18  ;;  %1602 = vmatpush.msrb.mxu1 %v3331_v19 }
 0x427   :  { %1622 = vmatpush.msrb.mxu2 %v3332_v20  ;;  %1642 = vmatpush.msrb.mxu3 %v3333_v23 }
 0x428   :  { %1583 = vmatpush.msrb.mxu0 %v3334_v51  ;;  %1603 = vmatpush.msrb.mxu1 %v3335_v6 }
 0x429   :  { %1623 = vmatpush.msrb.mxu2 %v3336_v62  ;;  %1643 = vmatpush.msrb.mxu3 %v3337_v3 }
 0x485   :  { %v1255_v59 = vpop.f32.mrf.mxu0  ;;  %v1275_v56 = vpop.f32.mrf.mxu1 }
 0x486   :  { %v1322_v61 = vrot.slane %v1255_v59, 6  ;;  %v1323_v60 = vrot.slane %v1275_v56, 6 }
 0x488   :  { %v1330_v57 = vadd.f32 %v1322_v61, %v3338_v54  ;;  %v1331_v26 = vadd.f32 %v1323_v60, %v3339_v25 }
 0x48a   :  { %v1788_v27 = vmul.f32 -1.442695, %v1330_v57  ;;  %v1789_v28 = vmul.f32 -1.442695, %v1331_v26 }
 0x48c   :  { %1887 = vpow2.f32 %v1788_v27  ;;  %v1295_v29 = vpop.f32.mrf.mxu2  ;;  %v1315_v46 = vpop.f32.mrf.mxu3 }
 0x48d   :  { %1889 = vpow2.f32 %v1789_v28  ;;  %v1324_v30 = vrot.slane %v1295_v29, 6  ;;  %v1325_v9 = vrot.slane %v1315_v46, 6 }
 0x48f   :  { %v1332_v32 = vadd.f32 %v1324_v30, %v3340_v31  ;;  %v1333_v43 = vadd.f32 %v1325_v9, %v3341_v44 }
 0x491   :  { %v1790_v33 = vmul.f32 -1.442695, %v1332_v32 }
 0x492   :  { %v1888_v12 = vpop.eup %1887 }
 0x493   :  { %v1890_v38 = vpop.eup %1889  ;;  %v1343_v10 = vadd.f32 1.0, %v1888_v12  ;;  %1891 = vpow2.f32 %v1790_v33 }
 0x494   :  { %v1344_v34 = vadd.f32 1.0, %v1890_v38 }
 0x495   :  { %1893 = vrcp.f32 %v1343_v10  ;;  %v1357_v35 = vand.u32 2147483648, %v1343_v10  ;;  %v1355_v42 = vand.u32 2147483647, %v1343_v10  ;;  %vm1351_vm2 = vweird.f32 %v1343_v10 }
 0x496   :  { %1895 = vrcp.f32 %v1344_v34  ;;  %v1372_v41 = vand.u32 2147483648, %v1344_v34  ;;  %v1370_v47 = vand.u32 2147483647, %v1344_v34  ;;  %vm1366_vm3 = vweird.f32 %v1344_v34 }
 0x497   :  { %v1358_v52 = vor.u32 1.1754944e-38, %v1357_v35  ;;  %vm1356_vm6 = vcmp.eq.f32.partialorder %v1355_v42, 8.507059e+37 }
 0x498   :  { %v1373_v63 = vor.u32 1.1754944e-38, %v1372_v41  ;;  %vm1371_vm7 = vcmp.eq.f32.partialorder %v1370_v47, 8.507059e+37 }
 0x499   :  { %v1892_v39 = vpop.eup %1891 }
 0x49a   :  { %v1345_v7 = vadd.f32 1.0, %v1892_v39 }
 0x49b   :  { %v1894_v45 = vpop.eup %1893 }
 0x49c   :  { %v1896_v37 = vpop.eup %1895  ;;  %v1347_v40 = vmul.f32 %v1894_v45, %v1343_v10  ;;  %1897 = vrcp.f32 %v1345_v7  ;;  %vm1352_vm0 = vweird.f32 %v1894_v45  ;;  %v1387_v11 = vand.u32 2147483648, %v1345_v7 }
 0x49d   :  { %v1362_v21 = vmul.f32 %v1896_v37, %v1344_v34  ;;  %1899 = vtanh.f32 %v1333_v43  ;;  %vm1367_vm1 = vweird.f32 %v1896_v37  ;;  %vm1353_vm4 = vmor %vm1351_vm2, %vm1352_vm0  ;;  %vm1381_vm9 = vweird.f32 %v1345_v7 }
 0x49e   :  { %v1348_v36 = vsub.f32 1.0, %v1347_v40  ;;  %vm1368_vm5 = vmor %vm1366_vm3, %vm1367_vm1  ;;  %v1385_v18 = vand.u32 2147483647, %v1345_v7  ;;  %v1388_v20 = vor.u32 1.1754944e-38, %v1387_v11 }
 0x49f   :  { %v1363_v8 = vsub.f32 1.0, %v1362_v21 }
 0x4a0   :  { %v1349_v13 = vmul.f32 %v1894_v45, %v1348_v36  ;;  %vm1386_vm11 = vcmp.eq.f32.partialorder %v1385_v18, 8.507059e+37 }
 0x4a1   :  { %v1364_v14 = vmul.f32 %v1896_v37, %v1363_v8 }
 0x4a2   :  { %v1898_v48 = vpop.eup %1897  ;;  %v1350_v49 = vadd.f32 %v1894_v45, %v1349_v13 }
 0x4a3   :  { %v1377_v24 = vmul.f32 %v1898_v48, %v1345_v7  ;;  %v1365_v2 = vadd.f32 %v1896_v37, %v1364_v14  ;;  %v1900_v5 = vpop.eup %1899  ;;  %vm1382_vm8 = vweird.f32 %v1898_v48 }
 0x4a4   :  { %v1354_v1 = vsel %vm1353_vm4, %v1894_v45, %v1350_v49  ;;  %vm1383_vm10 = vmor %vm1381_vm9, %vm1382_vm8 }
 0x4a5   :  { %v1378_v0 = vsub.f32 1.0, %v1377_v24  ;;  %v1359_v55 = vsel %vm1356_vm6, %v1358_v52, %v1354_v1  ;;  %v1369_v22 = vsel %vm1368_vm5, %v1896_v37, %v1365_v2 }
 0x4a6   :  { %v1374_v53 = vsel %vm1371_vm7, %v1373_v63, %v1369_v22  ;;  %v1396_v58 = vmul.f32 %v1900_v5, %v1359_v55 }
 0x4a7   :  { %v1395_v50 = vmul.f32 %v1393_v4, %v1374_v53  ;;  %v1379_v15 = vmul.f32 %v1898_v48, %v1378_v0 }
 0x4a9   :  { %v3029_v16 = vadd.f32 %v1396_v58, %v1395_v50  ;;  %v1380_v17 = vadd.f32 %v1898_v48, %v1379_v15 }
 0x4ab   :  { %1901 = vtanh.f32 %v3029_v16  ;;  %v1384_v19 = vsel %vm1383_vm10, %v1898_v48, %v1380_v17  ;;  %v1558_v2 = vrot.slane %v3029_v16, 6 }
 0x4ac   :  { %v1389_v51 = vsel %vm1386_vm11, %v1388_v20, %v1384_v19 }
 0x4b1   :  { %v1902_v23 = vpop.eup %1901 }
 0x4b2   :  { %v1399_v6 = vmul.f32 %v1902_v23, %v1389_v51 }
 0x4b4   :  { %v1401_v62 = vrot.slane %v1399_v6, 2 }
 0x4b6   :  { %1419 = vmatmul.f32.vlgmr.msra.gmra.mxu0 %v1401_v62  ;;  %1439 = vmatmul.f32.vlgmr.msra.gmra.mxu1 %v1401_v62 }
 0x4b7   :  { %1459 = vmatmul.f32.vlgmr.msra.gmra.mxu2 %v1401_v62  ;;  %1479 = vmatmul.f32.vlgmr.msra.gmra.mxu3 %v1401_v62 }
 0x533   :  { %v1420_v3 = vpop.f32.mrf.mxu0  ;;  %v1440_v59 = vpop.f32.mrf.mxu1 }
 0x534   :  { %v1487_v56 = vrot.slane %v1420_v3, 4  ;;  %v1488_v61 = vrot.slane %v1440_v59, 4 }
 0x536   :  { %v1495_v60 = vadd.f32 %v1487_v56, %v3338_v54  ;;  %v1496_v57 = vadd.f32 %v1488_v61, %v3339_v25 }
 0x538   :  { %v1791_v26 = vmul.f32 -1.442695, %v1495_v60  ;;  %v1792_v27 = vmul.f32 -1.442695, %v1496_v57 }
 0x53a   :  { %1903 = vpow2.f32 %v1791_v26  ;;  %v1460_v28 = vpop.f32.mrf.mxu2  ;;  %v1480_v34 = vpop.f32.mrf.mxu3 }
 0x53b   :  { %1905 = vpow2.f32 %v1792_v27  ;;  %v1489_v29 = vrot.slane %v1460_v28, 4  ;;  %v1490_v46 = vrot.slane %v1480_v34, 4 }
 0x53d   :  { %v1497_v30 = vadd.f32 %v1489_v29, %v3340_v31  ;;  %v1498_v45 = vadd.f32 %v1490_v46, %v3341_v44 }
 0x53f   :  { %v1793_v32 = vmul.f32 -1.442695, %v1497_v30 }
 0x540   :  { %v1904_v33 = vpop.eup %1903 }
 0x541   :  { %v1906_v12 = vpop.eup %1905  ;;  %v1508_v38 = vadd.f32 1.0, %v1904_v33  ;;  %1907 = vpow2.f32 %v1793_v32 }
 0x542   :  { %v1509_v10 = vadd.f32 1.0, %v1906_v12 }
 0x543   :  { %1909 = vrcp.f32 %v1508_v38  ;;  %v1522_v8 = vand.u32 2147483648, %v1508_v38  ;;  %v1520_v13 = vand.u32 2147483647, %v1508_v38  ;;  %vm1516_vm14 = vweird.f32 %v1508_v38 }
 0x544   :  { %1911 = vrcp.f32 %v1509_v10  ;;  %v1537_v35 = vand.u32 2147483648, %v1509_v10  ;;  %v1535_v14 = vand.u32 2147483647, %v1509_v10  ;;  %vm1531_vm15 = vweird.f32 %v1509_v10 }
 0x545   :  { %v1523_v24 = vor.u32 1.1754944e-38, %v1522_v8  ;;  %vm1521_vm2 = vcmp.eq.f32.partialorder %v1520_v13, 8.507059e+37 }
 0x546   :  { %v1538_v4 = vor.u32 1.1754944e-38, %v1537_v35  ;;  %vm1536_vm3 = vcmp.eq.f32.partialorder %v1535_v14, 8.507059e+37 }
 0x547   :  { %v1908_v9 = vpop.eup %1907 }
 0x548   :  { %v1510_v39 = vadd.f32 1.0, %v1908_v9 }
 0x549   :  { %v1910_v7 = vpop.eup %1909 }
 0x54a   :  { %v1912_v43 = vpop.eup %1911  ;;  %v1512_v37 = vmul.f32 %v1910_v7, %v1508_v38  ;;  %1913 = vrcp.f32 %v1510_v39  ;;  %vm1517_vm12 = vweird.f32 %v1910_v7  ;;  %v1552_v16 = vand.u32 2147483648, %v1510_v39 }
 0x54b   :  { %v1527_v40 = vmul.f32 %v1912_v43, %v1509_v10  ;;  %1915 = vtanh.f32 %v1498_v45  ;;  %vm1532_vm13 = vweird.f32 %v1912_v43  ;;  %vm1518_vm0 = vmor %vm1516_vm14, %vm1517_vm12  ;;  %vm1546_vm5 = vweird.f32 %v1510_v39 }
 0x54c   :  { %v1513_v21 = vsub.f32 1.0, %v1512_v37  ;;  %vm1533_vm1 = vmor %vm1531_vm15, %vm1532_vm13  ;;  %v1550_v11 = vand.u32 2147483647, %v1510_v39  ;;  %v1553_v19 = vor.u32 1.1754944e-38, %v1552_v16 }
 0x54d   :  { %v1528_v36 = vsub.f32 1.0, %v1527_v40 }
 0x54e   :  { %v1514_v41 = vmul.f32 %v1910_v7, %v1513_v21  ;;  %vm1551_vm7 = vcmp.eq.f32.partialorder %v1550_v11, 8.507059e+37 }
 0x54f   :  { %v1529_v42 = vmul.f32 %v1912_v43, %v1528_v36 }
 0x550   :  { %v1914_v47 = vpop.eup %1913  ;;  %v1515_v48 = vadd.f32 %v1910_v7, %v1514_v41 }
 0x551   :  { %v1542_v49 = vmul.f32 %v1914_v47, %v1510_v39  ;;  %v1530_v52 = vadd.f32 %v1912_v43, %v1529_v42  ;;  %v1916_v1 = vpop.eup %1915  ;;  %vm1547_vm4 = vweird.f32 %v1914_v47 }
 0x552   :  { %v1519_v63 = vsel %vm1518_vm0, %v1910_v7, %v1515_v48  ;;  %vm1548_vm6 = vmor %vm1546_vm5, %vm1547_vm4 }
 0x553   :  { %v1543_v5 = vsub.f32 1.0, %v1542_v49  ;;  %v1524_v0 = vsel %vm1521_vm2, %v1523_v24, %v1519_v63  ;;  %v1534_v55 = vsel %vm1533_vm1, %v1912_v43, %v1530_v52 }
 0x554   :  { %v1539_v22 = vsel %vm1536_vm3, %v1538_v4, %v1534_v55  ;;  %v1561_v53 = vmul.f32 %v1916_v1, %v1524_v0 }
 0x555   :  { %v1560_v58 = vmul.f32 %v1558_v2, %v1539_v22  ;;  %v1544_v50 = vmul.f32 %v1914_v47, %v1543_v5 }
 0x557   :  { %v3037_v15 = vadd.f32 %v1561_v53, %v1560_v58  ;;  %v1545_v17 = vadd.f32 %v1914_v47, %v1544_v50 }
 0x559   :  { %1917 = vtanh.f32 %v3037_v15  ;;  %v1549_v18 = vsel %vm1548_vm6, %v1914_v47, %v1545_v17  ;;  %v1723_v47 = vrot.slane %v3037_v15, 6 }
 0x55a   :  { %v1554_v23 = vsel %vm1551_vm7, %v1553_v19, %v1549_v18 }
 0x55f   :  { %v1918_v20 = vpop.eup %1917 }
 0x560   :  { %v1564_v51 = vmul.f32 %v1918_v20, %v1554_v23 }
 0x562   :  { %v1566_v6 = vrot.slane %v1564_v51, 4 }
 0x564   :  { %1584 = vmatmul.f32.vlgmr.msrb.gmra.mxu0 %v1566_v6  ;;  %1604 = vmatmul.f32.vlgmr.msrb.gmra.mxu1 %v1566_v6 }
 0x565   :  { %1624 = vmatmul.f32.vlgmr.msrb.gmra.mxu2 %v1566_v6  ;;  %1644 = vmatmul.f32.vlgmr.msrb.gmra.mxu3 %v1566_v6 }
 0x5e1   :  { %v1585_v62 = vpop.f32.mrf.mxu0  ;;  %v1605_v3 = vpop.f32.mrf.mxu1 }
 0x5e2   :  { %v1652_v59 = vrot.slane %v1585_v62, 2  ;;  %v1653_v56 = vrot.slane %v1605_v3, 2 }
 0x5e4   :  { %v1660_v61 = vadd.f32 %v1652_v59, %v3338_v54  ;;  %v1661_v60 = vadd.f32 %v1653_v56, %v3339_v25 }
 0x5e6   :  { %v1794_v57 = vmul.f32 -1.442695, %v1660_v61  ;;  %v1795_v26 = vmul.f32 -1.442695, %v1661_v60 }
 0x5e8   :  { %1919 = vpow2.f32 %v1794_v57  ;;  %v1625_v27 = vpop.f32.mrf.mxu2  ;;  %v1645_v10 = vpop.f32.mrf.mxu3 }
 0x5e9   :  { %1921 = vpow2.f32 %v1795_v26  ;;  %v1654_v28 = vrot.slane %v1625_v27, 2  ;;  %v1655_v54 = vrot.slane %v1645_v10, 2 }
 0x5eb   :  { %v1662_v29 = vadd.f32 %v1654_v28, %v3340_v31  ;;  %v1663_v9 = vadd.f32 %v1655_v54, %v3341_v44 }
 0x5ed   :  { %v1796_v30 = vmul.f32 -1.442695, %v1662_v29 }
 0x5ee   :  { %v1920_v32 = vpop.eup %1919 }
 0x5ef   :  { %v1922_v33 = vpop.eup %1921  ;;  %v1673_v12 = vadd.f32 1.0, %v1920_v32  ;;  %1923 = vpow2.f32 %v1796_v30 }
 0x5f0   :  { %v1674_v38 = vadd.f32 1.0, %v1922_v33 }
 0x5f1   :  { %1925 = vrcp.f32 %v1673_v12  ;;  %v1687_v37 = vand.u32 2147483648, %v1673_v12  ;;  %v1685_v36 = vand.u32 2147483647, %v1673_v12  ;;  %vm1681_vm10 = vweird.f32 %v1673_v12 }
 0x5f2   :  { %1927 = vrcp.f32 %v1674_v38  ;;  %v1702_v40 = vand.u32 2147483648, %v1674_v38  ;;  %v1700_v35 = vand.u32 2147483647, %v1674_v38  ;;  %vm1696_vm11 = vweird.f32 %v1674_v38 }
 0x5f3   :  { %v1688_v42 = vor.u32 1.1754944e-38, %v1687_v37  ;;  %vm1686_vm13 = vcmp.eq.f32.partialorder %v1685_v36, 8.507059e+37 }
 0x5f4   :  { %v1703_v48 = vor.u32 1.1754944e-38, %v1702_v40  ;;  %vm1701_vm15 = vcmp.eq.f32.partialorder %v1700_v35, 8.507059e+37 }
 0x5f5   :  { %v1924_v34 = vpop.eup %1923 }
 0x5f6   :  { %v1675_v25 = vadd.f32 1.0, %v1924_v34 }
 0x5f7   :  { %v1926_v46 = vpop.eup %1925 }
 0x5f8   :  { %v1928_v39 = vpop.eup %1927  ;;  %v1677_v7 = vmul.f32 %v1926_v46, %v1673_v12  ;;  %1929 = vrcp.f32 %v1675_v25  ;;  %vm1682_vm8 = vweird.f32 %v1926_v46  ;;  %v1717_v53 = vand.u32 2147483648, %v1675_v25 }
 0x5f9   :  { %v1692_v45 = vmul.f32 %v1928_v39, %v1674_v38  ;;  %1931 = vtanh.f32 %v1663_v9  ;;  %vm1697_vm9 = vweird.f32 %v1928_v39  ;;  %vm1683_vm12 = vmor %vm1681_vm10, %vm1682_vm8  ;;  %vm1711_vm1 = vweird.f32 %v1675_v25 }
 0x5fa   :  { %v1678_v31 = vsub.f32 1.0, %v1677_v7  ;;  %vm1698_vm14 = vmor %vm1696_vm11, %vm1697_vm9  ;;  %v1715_v58 = vand.u32 2147483647, %v1675_v25  ;;  %v1718_v15 = vor.u32 1.1754944e-38, %v1717_v53 }
 0x5fb   :  { %v1693_v43 = vsub.f32 1.0, %v1692_v45 }
 0x5fc   :  { %v1679_v21 = vmul.f32 %v1926_v46, %v1678_v31  ;;  %vm1716_vm3 = vcmp.eq.f32.partialorder %v1715_v58, 8.507059e+37 }
 0x5fd   :  { %v1694_v8 = vmul.f32 %v1928_v39, %v1693_v43 }
 0x5fe   :  { %v1930_v41 = vpop.eup %1929  ;;  %v1680_v13 = vadd.f32 %v1926_v46, %v1679_v21 }
 0x5ff   :  { %v1707_v44 = vmul.f32 %v1930_v41, %v1675_v25  ;;  %v1695_v14 = vadd.f32 %v1928_v39, %v1694_v8  ;;  %v1932_v24 = vpop.eup %1931  ;;  %vm1712_vm0 = vweird.f32 %v1930_v41 }
 0x600   :  { %v1684_v49 = vsel %vm1683_vm12, %v1926_v46, %v1680_v13  ;;  %vm1713_vm2 = vmor %vm1711_vm1, %vm1712_vm0 }
 0x601   :  { %v1708_v52 = vsub.f32 1.0, %v1707_v44  ;;  %v1689_v2 = vsel %vm1686_vm13, %v1688_v42, %v1684_v49  ;;  %v1699_v4 = vsel %vm1698_vm14, %v1928_v39, %v1695_v14 }
 0x602   :  { %v1726_v63 = vmul.f32 %v1932_v24, %v1689_v2  ;;  %v1704_v1 = vsel %vm1701_vm15, %v1703_v48, %v1699_v4 }
 0x603   :  { %v1709_v5 = vmul.f32 %v1930_v41, %v1708_v52  ;;  %v1725_v0 = vmul.f32 %v1723_v47, %v1704_v1 }
 0x605   :  { %v1727_v55 = vadd.f32 %v1726_v63, %v1725_v0  ;;  %v1710_v22 = vadd.f32 %v1930_v41, %v1709_v5 }
 0x607   :  { %1933 = vtanh.f32 %v1727_v55  ;;  %1732 = vst [vmem:[#allocation7 - $0x4] sm:$0xc0] %v1727_v55  ;;  %v1714_v50 = vsel %vm1713_vm2, %v1930_v41, %v1710_v22 }
 0x608   :  { %v1719_v16 = vsel %vm1716_vm3, %v1718_v15, %v1714_v50 }
 0x60d   :  { %v1934_v17 = vpop.eup %1933 }
 0x60e   :  { %v1729_v11 = vmul.f32 %v1934_v17, %v1719_v16 }
 0x610   :  { %1730 = vst [vmem:[#allocation7 - $0x6] sm:$0xc0] %v1729_v11 }
 0x611   :  { %1745 = dma.vmem_to_hbm [thread:$0]  %s1738_s26, 64, %s1740_s29, [#allocation4], %s2079_s21, %s2079_s21, %s2085_s30  }
 0x612   :  { %2075 = dma.done.wait [#allocation4], 64  }
 0x613   :  { %2076 = vsyncadd [#allocation4], 4294967232 }
 0x614   :  { %1750 = vsyncpa [#allocation3], 1 }
 0x615   :  { %1751 = vsyncpa [#allocation6], 1 }
 0x616   :  { %1752 = vsyncpa [#allocation4], 1 }

</bundles_post_ra>
